<compile_context>
chip_gen: v6e
topology: v6e:2x2x1
jax: 0.10.0
libtpu: 0.0.40
codegen_flags: <defaults>
</compile_context>

<pallas_src>
import math
from functools import partial

import numpy as np
import jax
import jax.numpy as jnp
from jax.experimental import pallas as pl
from jax.experimental.pallas import tpu as pltpu

LN_EPS = 1e-6
NEG_INF = -1e9


# --------------------------- per-generation tuning -------------------------

def _tpu_vmem_capacity_bytes():
    try:
        return int(pltpu.get_tpu_info().vmem_capacity_bytes)
    except Exception:
        return 64 * 1024 * 1024          # conservative (v7x-sized) fallback


_VMEM_PHYS = _tpu_vmem_capacity_bytes()
if _VMEM_PHYS >= 100 * 1024 * 1024:      # v5e / v6e : 128 MiB VMEM
    ROW_TILE_PREF = 512                  # bigger blocks -> closer to HBM roofline
    VMEM_LIMIT = 96 * 1024 * 1024
else:                                    # v7x : 64 MiB physical VMEM
    ROW_TILE_PREF = 256
    VMEM_LIMIT = 48 * 1024 * 1024
FF_CHUNK_PREF = 1024                     # streamed 4H chunk width in the fused FFN


def _probe_single_buffered_weights():
    """Probe pl.Buffered(1) on a constant-index operand (halves weight VMEM).
    Falls back to default double-buffering if the API is absent or misbehaves."""
    try:
        def k(x_ref, o_ref):
            o_ref[...] = x_ref[...] + 1.0

        x = jnp.arange(8 * 128, dtype=jnp.float32).reshape(8, 128)
        out = pl.pallas_call(
            k,
            out_shape=jax.ShapeDtypeStruct((16, 128), jnp.float32),
            grid=(2,),
            in_specs=[pl.BlockSpec((8, 128), lambda i: (0, 0),
                                   pipeline_mode=pl.Buffered(1))],
            out_specs=pl.BlockSpec((8, 128), lambda i: (i, 0)),
        )(x)
        out = np.asarray(jax.device_get(out))
        ref = np.asarray(jax.device_get(x)) + 1.0
        return bool(np.allclose(out[:8], ref) and np.allclose(out[8:], ref))
    except Exception:
        return False


_SINGLE_BUFFER_OK = _probe_single_buffered_weights()


def _const_spec(block_shape):
    """BlockSpec for grid-invariant (weight / bias) operands: single-buffered
    when supported so multi-MiB weights are not double-buffered for nothing."""
    zero_map = lambda *_: (0,) * len(block_shape)
    if _SINGLE_BUFFER_OK:
        return pl.BlockSpec(block_shape, zero_map, pipeline_mode=pl.Buffered(1))
    return pl.BlockSpec(block_shape, zero_map)


def _row_tile(m, pref):
    """Largest divisor of m that is <= pref, preferring multiples of 8
    (sublane-aligned). Never falls back to the full (possibly huge) extent."""
    if m <= pref:
        return m
    best = 1
    for t in range(pref, 0, -1):
        if m % t == 0:
            if t % 8 == 0:
                return t
            if best == 1:
                best = t
    return best


def _compiler_params(dim_semantics):
    return pltpu.CompilerParams(
        dimension_semantics=tuple(dim_semantics),
        vmem_limit_bytes=VMEM_LIMIT)


def _gelu_f32(x):
    # BERT tanh-approx GELU (f32)
    return 0.5 * x * (1.0 + jnp.tanh(math.sqrt(2.0 / math.pi) * (x + 0.044715 * x ** 3)))


def _layernorm_f32(x, g, b):
    mean = jnp.mean(x, axis=-1, keepdims=True)
    var = jnp.mean(jnp.square(x - mean), axis=-1, keepdims=True)
    return (x - mean) * jax.lax.rsqrt(var + LN_EPS) * g + b


# ---------------------------------------------------------------------------
# Kernel 1: fused LayerNorm + [K1 | V1 | Q2] projection  (row-tiled, W resident)
# ---------------------------------------------------------------------------

def _ln_kvq_kernel(x_ref, g_ref, b_ref, w_ref, bias_ref, kv_ref, q_ref, *, hidden):
    x = x_ref[...].astype(jnp.float32)
    xn = _layernorm_f32(x, g_ref[...].astype(jnp.float32), b_ref[...].astype(jnp.float32))
    y = jnp.dot(xn.astype(jnp.bfloat16), w_ref[...],
                preferred_element_type=jnp.float32) + bias_ref[...].astype(jnp.float32)
    kv_ref[...] = y[:, : 2 * hidden].astype(kv_ref.dtype)   # [K1 | V1]
    q_ref[...] = y[:, 2 * hidden:].astype(q_ref.dtype)      # Q2 (scale pre-folded)


def ln_kvq_proj(x2d, gamma, beta, w_kvq, b_kvq):
    m, h = x2d.shape
    tm = _row_tile(m, ROW_TILE_PREF)
    # TODO(synk): add K-reduction tiling of w_kvq (6*H^2 bytes bf16) for H >~ 2K.
    return pl.pallas_call(
        partial(_ln_kvq_kernel, hidden=h),
        out_shape=(jax.ShapeDtypeStruct((m, 2 * h), jnp.bfloat16),
                   jax.ShapeDtypeStruct((m, h), jnp.bfloat16)),
        grid=(m // tm,),
        in_specs=[
            pl.BlockSpec((tm, h), lambda i: (i, 0)),
            _const_spec((1, h)),
            _const_spec((1, h)),
            _const_spec((h, 3 * h)),
            _const_spec((1, 3 * h)),
        ],
        out_specs=(
            pl.BlockSpec((tm, 2 * h), lambda i: (i, 0)),
            pl.BlockSpec((tm, h), lambda i: (i, 0)),
        ),
        compiler_params=_compiler_params(("parallel",)),
        cost_estimate=pl.CostEstimate(
            flops=int(2 * m * h * 3 * h), transcendentals=int(m),
            bytes_accessed=int(m * h * 4 + w_kvq.size * 2 + m * 3 * h * 2)),
    )(x2d, gamma, beta, w_kvq, b_kvq)


# ---------------------------------------------------------------------------
# Kernel 2: stage-1 "extract" attention — routers attend over the masked sequence.
# One grid step per batch element; per-head results concatenated and stored with
# one lane-dense (R, H) write; attn_1 stores are S-lane-dense.
# ---------------------------------------------------------------------------

def _extract_attn_kernel(q_ref, kv_ref, m_ref, o_ref, a_ref, *,
                         num_heads, head_dim, hidden):
    keep = m_ref[0] > 0                                # (1, S) bool, shared across heads
    outs = []
    for h in range(num_heads):
        lo = h * head_dim
        # NOTE: per-head lane slicing of the packed (S, 2H) block still costs a
        # read-side relayout; all stores below are lane-dense.
        q_h = q_ref[:, lo:lo + head_dim]               # (R, Dh) bf16, scale pre-folded
        k_h = kv_ref[0, :, lo:lo + head_dim]           # (S, Dh) bf16
        v_h = kv_ref[0, :, hidden + lo:hidden + lo + head_dim]
        s = jax.lax.dot_general(q_h, k_h, (((1,), (1,)), ((), ())),
                                preferred_element_type=jnp.float32)      # (R, S)
        # masked_fill(mask == 0, -1e9): a fully-masked sequence yields a uniform
        # softmax, exactly matching the PyTorch reference (keep jnp.where).
        s = jnp.where(keep, s, NEG_INF)
        s = s - jnp.max(s, axis=-1, keepdims=True)
        p = jnp.exp(s)
        p = p / jnp.sum(p, axis=-1, keepdims=True)     # exact: probs are module outputs
        a_ref[0, h] = p                                # (R, S) — lane-dense over S
        outs.append(jnp.dot(p.astype(jnp.bfloat16), v_h,
                            preferred_element_type=jnp.float32))
    # one full-width (R, H) store instead of num_heads masked (R, Dh) stores
    o_ref[0] = jnp.concatenate(outs, axis=-1).astype(o_ref.dtype)


def extract_attention(q1, kv1, mask, num_heads):
    """q1: (R, H) bf16 (batch-independent, scale folded), kv1: (B, S, 2H) bf16,
    mask: (B, S)."""
    B, S, two_h = kv1.shape
    H = two_h // 2
    R = q1.shape[0]
    Dh = H // num_heads
    mask3 = mask.astype(jnp.int32).reshape(B, 1, S)
    # TODO(synk): for very long S on v7x, tile S flash-style (m, l, acc scratch);
    #             kept whole-S per batch here since attn_1 (R, S) must be emitted.
    out, attn = pl.pallas_call(
        partial(_extract_attn_kernel, num_heads=num_heads, head_dim=Dh, hidden=H),
        out_shape=(jax.ShapeDtypeStruct((B, R, H), jnp.bfloat16),
                   jax.ShapeDtypeStruct((B, num_heads, R, S), jnp.float32)),
        grid=(B,),
        in_specs=[
            _const_spec((R, H)),                               # q1: grid-invariant
            pl.BlockSpec((1, S, two_h), lambda b: (b, 0, 0)),
            pl.BlockSpec((1, 1, S), lambda b: (b, 0, 0)),
        ],
        out_specs=(
            pl.BlockSpec((1, R, H), lambda b: (b, 0, 0)),
            pl.BlockSpec((1, num_heads, R, S), lambda b: (b, 0, 0, 0)),
        ),
        compiler_params=_compiler_params(("parallel",)),
        cost_estimate=pl.CostEstimate(
            flops=int(4 * B * R * S * H),
            transcendentals=int(B * num_heads * R * S),
            bytes_accessed=int(kv1.size * 2 + B * num_heads * R * S * 4 + B * R * H * 2)),
    )(q1, kv1, mask3)
    return out, attn


# ---------------------------------------------------------------------------
# Kernel 3: fused router-side projections:  hidden_states = h1 @ W_o1 + b_o1,
#           kv2 = hidden_states @ [Wk2 | Wv2] + b.  B*R rows are tiny, so the
#           two matmuls are chained inside a single grid step (no HBM round
#           trip for hidden_states between them).
# ---------------------------------------------------------------------------

def _router_proj_kernel(h1_ref, wo1_ref, bo1_ref, wkv2_ref, bkv2_ref, hs_ref, kv2_ref):
    hs = jnp.dot(h1_ref[...], wo1_ref[...],
                 preferred_element_type=jnp.float32) + bo1_ref[...].astype(jnp.float32)
    hs_ref[...] = hs.astype(hs_ref.dtype)
    kv2 = jnp.dot(hs.astype(jnp.bfloat16), wkv2_ref[...],
                  preferred_element_type=jnp.float32) + bkv2_ref[...].astype(jnp.float32)
    kv2_ref[...] = kv2.astype(kv2_ref.dtype)


def router_projections(h1_2d, w_o1, b_o1, w_kv2, b_kv2):
    m, H = h1_2d.shape
    return pl.pallas_call(
        _router_proj_kernel,
        out_shape=(jax.ShapeDtypeStruct((m, H), jnp.float32),
                   jax.ShapeDtypeStruct((m, 2 * H), jnp.bfloat16)),
        grid=(1,),
        in_specs=[
            pl.BlockSpec((m, H), lambda i: (0, 0)),
            _const_spec((H, H)),
            _const_spec((1, H)),
            _const_spec((H, 2 * H)),
            _const_spec((1, 2 * H)),
        ],
        out_specs=(
            pl.BlockSpec((m, H), lambda i: (0, 0)),
            pl.BlockSpec((m, 2 * H), lambda i: (0, 0)),
        ),
        compiler_params=_compiler_params(("arbitrary",)),
        cost_estimate=pl.CostEstimate(
            flops=int(2 * m * H * H + 4 * m * H * H), transcendentals=0,
            bytes_accessed=int(m * H * 2 + (w_o1.size + w_kv2.size) * 2
                               + m * H * 4 + m * 2 * H * 2)),
    )(h1_2d, w_o1, b_o1, w_kv2, b_kv2)


# ---------------------------------------------------------------------------
# Kernel 4: stage-2 "denoise" attention — sequence attends over the R routers.
# Grid tiles (batch, S query tiles); softmax is over R so it stays tile-local.
# Output and attn_2 are written lane-dense (attn_2 as an (S, Hn*R) slab).
# ---------------------------------------------------------------------------

def _denoise_attn_kernel(q_ref, kv_ref, o_ref, a_ref, *, num_heads, head_dim, hidden):
    outs = []
    probs = []
    for h in range(num_heads):
        lo = h * head_dim
        q_h = q_ref[0, :, lo:lo + head_dim]            # (tS, Dh) bf16, scale pre-folded
        k_h = kv_ref[0, :, lo:lo + head_dim]           # (R, Dh) bf16
        v_h = kv_ref[0, :, hidden + lo:hidden + lo + head_dim]
        s = jax.lax.dot_general(q_h, k_h, (((1,), (1,)), ((), ())),
                                preferred_element_type=jnp.float32)      # (tS, R)
        s = s - jnp.max(s, axis=-1, keepdims=True)
        p = jnp.exp(s)
        p = p / jnp.sum(p, axis=-1, keepdims=True)
        probs.append(p)
        outs.append(jnp.dot(p.astype(jnp.bfloat16), v_h,
                            preferred_element_type=jnp.float32))
    o_ref[0] = jnp.concatenate(outs, axis=-1).astype(o_ref.dtype)   # (tS, H) lane-dense
    a_ref[0] = jnp.concatenate(probs, axis=-1)                      # (tS, Hn*R) slab


def denoise_attention(q2, kv2, num_heads):
    """q2: (B, S, H) bf16, kv2: (B, R, 2H) bf16.  Returns out (B, S, H) bf16 and
    attn_2 packed as an S-lane-dense (B, S, Hn*R) slab (reshaped in the wrapper)."""
    B, S, H = q2.shape
    R, two_h = kv2.shape[1], kv2.shape[2]
    Dh = H // num_heads
    tS = _row_tile(S, ROW_TILE_PREF)
    out, slab = pl.pallas_call(
        partial(_denoise_attn_kernel, num_heads=num_heads, head_dim=Dh, hidden=H),
        out_shape=(jax.ShapeDtypeStruct((B, S, H), jnp.bfloat16),
                   jax.ShapeDtypeStruct((B, S, num_heads * R), jnp.float32)),
        grid=(B, S // tS),
        in_specs=[
            pl.BlockSpec((1, tS, H), lambda b, s: (b, s, 0)),
            pl.BlockSpec((1, R, two_h), lambda b, s: (b, 0, 0)),
        ],
        out_specs=(
            pl.BlockSpec((1, tS, H), lambda b, s: (b, s, 0)),
            pl.BlockSpec((1, tS, num_heads * R), lambda b, s: (b, s, 0)),
        ),
        compiler_params=_compiler_params(("parallel", "parallel")),
        cost_estimate=pl.CostEstimate(
            flops=int(4 * B * S * R * H),
            transcendentals=int(B * num_heads * S * R),
            bytes_accessed=int(q2.size * 2 + kv2.size * 2 + B * S * H * 2
                               + B * S * num_heads * R * 4)),
    )(q2, kv2)
    return out, slab


# ---------------------------------------------------------------------------
# Kernel 5: fused  x1 = x + h2 @ W_o2 + b_o2 ;  out = x1 + W2(GELU(W1 LN(x1)))
# Row-tiled; the 4H dimension is streamed in chunks over an 'arbitrary' grid
# axis with an f32 accumulator, so W1/W2 are never fully VMEM-resident and x1
# never round-trips HBM.
# ---------------------------------------------------------------------------

def _attnout_ffn_kernel(h2_ref, x_ref, wo2_ref, bo2_ref, g_ref, b_ref,
                        w1_ref, b1_ref, w2_ref, b2_ref, o_ref,
                        xn_ref, acc_ref):
    c = pl.program_id(1)

    @pl.when(c == 0)
    def _():
        # residual + fused W_o2 projection of the denoising-attention output
        x1 = (x_ref[...].astype(jnp.float32)
              + jnp.dot(h2_ref[...], wo2_ref[...], preferred_element_type=jnp.float32)
              + bo2_ref[...].astype(jnp.float32))
        xn = _layernorm_f32(x1, g_ref[...].astype(jnp.float32),
                            b_ref[...].astype(jnp.float32))
        xn_ref[...] = xn.astype(jnp.bfloat16)
        acc_ref[...] = x1 + b2_ref[...].astype(jnp.float32)

    mid = jnp.dot(xn_ref[...], w1_ref[...],
                  preferred_element_type=jnp.float32) + b1_ref[...].astype(jnp.float32)
    mid = _gelu_f32(mid)
    acc_ref[...] += jnp.dot(mid.astype(jnp.bfloat16), w2_ref[...],
                            preferred_element_type=jnp.float32)

    @pl.when(c == pl.num_programs(1) - 1)
    def _():
        o_ref[...] = acc_ref[...].astype(o_ref.dtype)


def attnout_ffn_sublayer(h2_2d, x2d, w_o2, b_o2, gamma, beta, w1, b1, w2, b2):
    m, h = x2d.shape
    f = w1.shape[1]
    tm = _row_tile(m, ROW_TILE_PREF)
    fc = _row_tile(f, FF_CHUNK_PREF)
    return pl.pallas_call(
        _attnout_ffn_kernel,
        out_shape=jax.ShapeDtypeStruct((m, h), x2d.dtype),
        grid=(m // tm, f // fc),
        in_specs=[
            pl.BlockSpec((tm, h), lambda i, c: (i, 0)),     # h2 (attention output, bf16)
            pl.BlockSpec((tm, h), lambda i, c: (i, 0)),     # x (residual, f32)
            _const_spec((h, h)),                            # W_o2
            _const_spec((1, h)),                            # b_o2
            _const_spec((1, h)),                            # LN2 gamma
            _const_spec((1, h)),                            # LN2 beta
            pl.BlockSpec((h, fc), lambda i, c: (0, c)),     # W1 chunk (streamed over 4H)
            pl.BlockSpec((1, fc), lambda i, c: (0, c)),     # b1 chunk
            pl.BlockSpec((fc, h), lambda i, c: (c, 0)),     # W2 chunk
            _const_spec((1, h)),                            # b2
        ],
        out_specs=pl.BlockSpec((tm, h), lambda i, c: (i, 0)),
        scratch_shapes=[pltpu.VMEM((tm, h), jnp.bfloat16),  # LN(x1) stash
                        pltpu.VMEM((tm, h), jnp.float32)],  # f32 accumulator
        compiler_params=_compiler_params(("parallel", "arbitrary")),
        cost_estimate=pl.CostEstimate(
            flops=int(2 * m * h * h + 4 * m * h * f),
            transcendentals=int(m * f),
            bytes_accessed=int(m * h * (2 + 4 + 4)
                               + (w_o2.size + w1.size + w2.size) * 2)),
    )(h2_2d, x2d, w_o2, b_o2, gamma, beta, w1, b1, w2, b2)


# ------------------------------ module glue -------------------------------

def init_params(key, hidden, attn_heads, feed_forward_hidden, attn_routers):
    del attn_heads
    keys = jax.random.split(key, 16)
    w = lambda k, s: (0.02 * jax.random.normal(k, s)).astype(jnp.float32)
    z = lambda s: jnp.zeros(s, jnp.float32)
    return {
        "ln1_g": jnp.ones((hidden,), jnp.float32), "ln1_b": z((hidden,)),
        "ln2_g": jnp.ones((hidden,), jnp.float32), "ln2_b": z((hidden,)),
        # ExtractorAndDenoising parameters
        "attn_routers": jax.random.normal(keys[0], (attn_routers, hidden)).astype(jnp.float32),
        "wq1": w(keys[1], (hidden, hidden)), "bq1": z((hidden,)),
        "wk1": w(keys[2], (hidden, hidden)), "bk1": z((hidden,)),
        "wv1": w(keys[3], (hidden, hidden)), "bv1": z((hidden,)),
        "wo1": w(keys[4], (hidden, hidden)), "bo1": z((hidden,)),
        "wq2": w(keys[5], (hidden, hidden)), "bq2": z((hidden,)),
        "wk2": w(keys[6], (hidden, hidden)), "bk2": z((hidden,)),
        "wv2": w(keys[7], (hidden, hidden)), "bv2": z((hidden,)),
        "wo2": w(keys[8], (hidden, hidden)), "bo2": z((hidden,)),
        # PositionwiseFeedForward parameters
        "ff_w1": w(keys[9], (hidden, feed_forward_hidden)), "ff_b1": z((feed_forward_hidden,)),
        "ff_w2": w(keys[10], (feed_forward_hidden, hidden)), "ff_b2": z((hidden,)),
        # DPBLLayer.routers — present in __init__ but unused in forward()
        "layer_routers": jax.random.normal(keys[11], (attn_routers, hidden)).astype(jnp.float32),
    }


def prepare_params(p, num_heads):
    """One-time parameter preparation: fuse per-stage K/V(/Q) weights into wide
    matmuls, cast matmul weights to bf16, fold the batch-independent stage-1
    router-query projection (routers @ Wq1 + bq1), and fold the softmax scale
    1/sqrt(Dh) into q1 and into the Q2 columns of the fused projection."""
    hidden = p["wq1"].shape[0]
    scale = 1.0 / math.sqrt(hidden // num_heads)
    bf = lambda a: a.astype(jnp.bfloat16)
    row = lambda a: a.reshape(1, -1).astype(jnp.float32)
    q1 = (p["attn_routers"] @ p["wq1"] + p["bq1"][None, :]) * scale
    w_kvq = jnp.concatenate([p["wk1"], p["wv1"], p["wq2"] * scale], axis=1)
    b_kvq = jnp.concatenate([p["bk1"], p["bv1"], p["bq2"] * scale])
    return {
        "ln1_g": row(p["ln1_g"]), "ln1_b": row(p["ln1_b"]),
        "ln2_g": row(p["ln2_g"]), "ln2_b": row(p["ln2_b"]),
        "q1": bf(q1),
        "w_kvq": bf(w_kvq), "b_kvq": row(b_kvq),
        "w_o1": bf(p["wo1"]), "b_o1": row(p["bo1"]),
        "w_kv2": bf(jnp.concatenate([p["wk2"], p["wv2"]], axis=1)),
        "b_kv2": row(jnp.concatenate([p["bk2"], p["bv2"]])),
        "w_o2": bf(p["wo2"]), "b_o2": row(p["bo2"]),
        "ff_w1": bf(p["ff_w1"]), "ff_b1": row(p["ff_b1"]),
        "ff_w2": bf(p["ff_w2"]), "ff_b2": row(p["ff_b2"]),
    }


def dpbl_layer_forward(prep, x, mask, num_heads):
    B, S, H = x.shape
    R = prep["q1"].shape[0]
    M = B * S
    x2d = x.reshape(M, H)

    # ---- input_sublayer: x + ExtractorAndDenoising(LayerNorm(x), mask) ----
    # Fused LN1 + [K1|V1|Q2] projection (one row-tiled kernel, one pass over x).
    kv1, q2 = ln_kvq_proj(x2d, prep["ln1_g"], prep["ln1_b"], prep["w_kvq"], prep["b_kvq"])
    kv1 = kv1.reshape(B, S, 2 * H)
    q2 = q2.reshape(B, S, H)

    # Stage 1 (Extractor): routers attend over the masked sequence.
    h1, attn_1 = extract_attention(prep["q1"], kv1, mask, num_heads)

    # Stage-1 output projection + stage-2 K/V projection fused (tiny B*R rows).
    hidden_states, kv2 = router_projections(
        h1.reshape(B * R, H), prep["w_o1"], prep["b_o1"], prep["w_kv2"], prep["b_kv2"])
    hidden_states = hidden_states.reshape(B, R, H)
    kv2 = kv2.reshape(B, R, 2 * H)

    # Stage 2 (Denoising): sequence attends over the router summaries (no mask).
    h2, attn2_slab = denoise_attention(q2, kv2, num_heads)
    # attn_2 was stored as an S-lane-dense (B, S, Hn*R) slab; restore (B, Hn, S, R).
    attn_2 = attn2_slab.reshape(B, S, num_heads, R).transpose(0, 2, 1, 3)

    # ---- W_o2 projection + residual + output_sublayer FFN, fully fused ----
    x2 = attnout_ffn_sublayer(h2.reshape(M, H), x2d,
                              prep["w_o2"], prep["b_o2"],
                              prep["ln2_g"], prep["ln2_b"],
                              prep["ff_w1"], prep["ff_b1"],
                              prep["ff_w2"], prep["ff_b2"])

    # self.dropout(x2) -> identity in eval mode
    return x2.reshape(B, S, H), attn_1, attn_2, hidden_states


if __name__ == "__main__":
    B, S = 2, 8
    hidden, attn_heads, attn_routers = 32, 4, 4
    feed_forward_hidden = 4 * hidden

    key = jax.random.PRNGKey(0)
    kp, kx = jax.random.split(key)
    params = init_params(kp, hidden, attn_heads, feed_forward_hidden, attn_routers)
    prep = prepare_params(params, attn_heads)

    x = jax.random.normal(kx, (B, S, hidden), jnp.float32)
    mask = jnp.ones((B, S), jnp.int32).at[1, -2:].set(0)  # pad out last 2 tokens of batch 1

    fwd = jax.jit(partial(dpbl_layer_forward, num_heads=attn_heads))
    out, attn_1, attn_2, hidden_states = fwd(prep, x, mask)
    jax.block_until_ready((out, attn_1, attn_2, hidden_states))

    assert out.shape == (B, S, hidden)
    assert attn_1.shape == (B, attn_heads, attn_routers, S)
    assert attn_2.shape == (B, attn_heads, S, attn_routers)
    assert hidden_states.shape == (B, attn_routers, hidden)
    assert bool(jnp.all(jnp.isfinite(out)))
    assert bool(jnp.all(jnp.isfinite(attn_1))) and bool(jnp.all(jnp.isfinite(attn_2)))
    # attention probabilities sum to 1 along the softmax axis (exact divide)
    assert bool(jnp.allclose(jnp.sum(attn_1, axis=-1), 1.0, atol=1e-4))
    assert bool(jnp.allclose(jnp.sum(attn_2, axis=-1), 1.0, atol=1e-4))
    print("KERNEL_OK")
</pallas_src>

<mosaic_0001>
module attributes {stable_mosaic.version = 11 : i64} {
  func.func @k(%arg0: i32, %arg1: memref<8x128xf32, #tpu.memory_space<vmem>>, %arg2: memref<8x128xf32, #tpu.memory_space<vmem>>) attributes {dimension_semantics = [#tpu.dimension_semantics<arbitrary>], iteration_bounds = array<i64: 2>, scalar_prefetch = 0 : i64, scratch_operands = 0 : i64, tpu.core_type = #tpu.core_type<tc>, window_params = [{pipeline_mode = #tpu.pipeline_mode<synchronous>, transform_indices = @transform_0, window_bounds = array<i64: 8, 128>}, {transform_indices = @transform_1, window_bounds = array<i64: 8, 128>}]} {
    %c0 = arith.constant 0 : index
    %c0_0 = arith.constant 0 : index
    %0 = vector.load %arg1[%c0, %c0_0] : memref<8x128xf32, #tpu.memory_space<vmem>>, vector<8x128xf32>
    %cst = arith.constant 1.000000e+00 : f32
    %1 = vector.broadcast %cst : f32 to vector<8x128xf32>
    %2 = arith.addf %0, %1 : vector<8x128xf32>
    %c0_1 = arith.constant 0 : index
    %c0_2 = arith.constant 0 : index
    %3 = vector.load %arg2[%c0_1, %c0_2] : memref<8x128xf32, #tpu.memory_space<vmem>>, vector<8x128xf32>
    tpu.vector_store %arg2[%c0_1, %c0_2], %2 {strides = array<i32>} : memref<8x128xf32, #tpu.memory_space<vmem>>, vector<8x128xf32>,
    return
  }
  func.func @transform_0(%arg0: i32) -> (i32, i32) {
    %c0_i32 = arith.constant 0 : i32
    %c0_i32_0 = arith.constant 0 : i32
    %c0_i32_1 = arith.constant 0 : i32
    return %c0_i32, %c0_i32_0 : i32, i32
  }
  func.func @transform_1(%arg0: i32) -> (i32, i32) {
    %c0_i32 = arith.constant 0 : i32
    %c0_i32_0 = arith.constant 0 : i32
    return %arg0, %c0_i32 : i32, i32
  }
}

module attributes {stable_mosaic.version = 11 : i64} {
  func.func @_denoise_attn_kernel(%arg0: i32, %arg1: i32, %arg2: memref<1x8x32xbf16, #tpu.memory_space<vmem>>, %arg3: memref<1x4x64xbf16, #tpu.memory_space<vmem>>, %arg4: memref<1x8x32xbf16, #tpu.memory_space<vmem>>, %arg5: memref<1x8x16xf32, #tpu.memory_space<vmem>>) attributes {dimension_semantics = [#tpu.dimension_semantics<parallel>, #tpu.dimension_semantics<parallel>], iteration_bounds = array<i64: 2, 1>, scalar_prefetch = 0 : i64, scratch_operands = 0 : i64, tpu.core_type = #tpu.core_type<tc>, window_params = [{transform_indices = @transform_0, window_bounds = array<i64: 1, 8, 32>}, {transform_indices = @transform_1, window_bounds = array<i64: 1, 4, 64>}, {transform_indices = @transform_2, window_bounds = array<i64: 1, 8, 32>}, {transform_indices = @transform_3, window_bounds = array<i64: 1, 8, 16>}]} {
    %c0 = arith.constant 0 : index
    %c0_0 = arith.constant 0 : index
    %c0_1 = arith.constant 0 : index
    %0 = vector.load %arg2[%c0, %c0_0, %c0_1] : memref<1x8x32xbf16, #tpu.memory_space<vmem>>, vector<1x8x8xbf16>
    %1 = vector.shape_cast %0 : vector<1x8x8xbf16> to vector<8x8xbf16>
    %c0_2 = arith.constant 0 : index
    %c0_3 = arith.constant 0 : index
    %c0_4 = arith.constant 0 : index
    %2 = vector.load %arg3[%c0_2, %c0_3, %c0_4] : memref<1x4x64xbf16, #tpu.memory_space<vmem>>, vector<1x4x8xbf16>
    %3 = vector.shape_cast %2 : vector<1x4x8xbf16> to vector<4x8xbf16>
    %c0_5 = arith.constant 0 : index
    %c0_6 = arith.constant 0 : index
    %c32 = arith.constant 32 : index
    %4 = vector.load %arg3[%c0_5, %c0_6, %c32] : memref<1x4x64xbf16, #tpu.memory_space<vmem>>, vector<1x4x8xbf16>
    %5 = vector.shape_cast %4 : vector<1x4x8xbf16> to vector<4x8xbf16>
    %cst = arith.constant dense<0.000000e+00> : vector<8x4xf32>
    %6 = tpu.matmul %1, %3, %cst {dimension_numbers = #tpu.dot_dimension_numbers<[1], [1], [0], [0], [0, 0, 1, 0], [], []>} : vector<8x8xbf16>, vector<4x8xbf16>, vector<8x4xf32> -> vector<8x4xf32>
    %cst_7 = arith.constant dense<0xFF800000> : vector<8xf32>
    %7 = vector.multi_reduction <maximumf>, %6, %cst_7 [1] : vector<8x4xf32> to vector<8xf32>
    %8 = vector.shape_cast %7 : vector<8xf32> to vector<8x1xf32>
    %9 = vector.broadcast %8 : vector<8x1xf32> to vector<8x4xf32>
    %10 = arith.subf %6, %9 : vector<8x4xf32>
    %11 = math.exp %10 : vector<8x4xf32>
    %cst_8 = arith.constant dense<0.000000e+00> : vector<8xf32>
    %12 = vector.multi_reduction <add>, %11, %cst_8 [1] : vector<8x4xf32> to vector<8xf32>
    %13 = vector.shape_cast %12 : vector<8xf32> to vector<8x1xf32>
    %14 = vector.broadcast %13 : vector<8x1xf32> to vector<8x4xf32>
    %15 = arith.divf %11, %14 : vector<8x4xf32>
    %16 = arith.truncf %15 : vector<8x4xf32> to vector<8x4xbf16>
    %cst_9 = arith.constant dense<0.000000e+00> : vector<8x8xf32>
    %17 = tpu.matmul %16, %5, %cst_9 {dimension_numbers = #tpu.dot_dimension_numbers<[1], [0], [0], [1], [0, 0, 1, 1], [], []>} : vector<8x4xbf16>, vector<4x8xbf16>, vector<8x8xf32> -> vector<8x8xf32>
    %c0_10 = arith.constant 0 : index
    %c0_11 = arith.constant 0 : index
    %c8 = arith.constant 8 : index
    %18 = vector.load %arg2[%c0_10, %c0_11, %c8] : memref<1x8x32xbf16, #tpu.memory_space<vmem>>, vector<1x8x8xbf16>
    %19 = vector.shape_cast %18 : vector<1x8x8xbf16> to vector<8x8xbf16>
    %c0_12 = arith.constant 0 : index
    %c0_13 = arith.constant 0 : index
    %c8_14 = arith.constant 8 : index
    %20 = vector.load %arg3[%c0_12, %c0_13, %c8_14] : memref<1x4x64xbf16, #tpu.memory_space<vmem>>, vector<1x4x8xbf16>
    %21 = vector.shape_cast %20 : vector<1x4x8xbf16> to vector<4x8xbf16>
    %c0_15 = arith.constant 0 : index
    %c0_16 = arith.constant 0 : index
    %c40 = arith.constant 40 : index
    %22 = vector.load %arg3[%c0_15, %c0_16, %c40] : memref<1x4x64xbf16, #tpu.memory_space<vmem>>, vector<1x4x8xbf16>
    %23 = vector.shape_cast %22 : vector<1x4x8xbf16> to vector<4x8xbf16>
    %cst_17 = arith.constant dense<0.000000e+00> : vector<8x4xf32>
    %24 = tpu.matmul %19, %21, %cst_17 {dimension_numbers = #tpu.dot_dimension_numbers<[1], [1], [0], [0], [0, 0, 1, 0], [], []>} : vector<8x8xbf16>, vector<4x8xbf16>, vector<8x4xf32> -> vector<8x4xf32>
    %cst_18 = arith.constant dense<0xFF800000> : vector<8xf32>
    %25 = vector.multi_reduction <maximumf>, %24, %cst_18 [1] : vector<8x4xf32> to vector<8xf32>
    %26 = vector.shape_cast %25 : vector<8xf32> to vector<8x1xf32>
    %27 = vector.broadcast %26 : vector<8x1xf32> to vector<8x4xf32>
    %28 = arith.subf %24, %27 : vector<8x4xf32>
    %29 = math.exp %28 : vector<8x4xf32>
    %cst_19 = arith.constant dense<0.000000e+00> : vector<8xf32>
    %30 = vector.multi_reduction <add>, %29, %cst_19 [1] : vector<8x4xf32> to vector<8xf32>
    %31 = vector.shape_cast %30 : vector<8xf32> to vector<8x1xf32>
    %32 = vector.broadcast %31 : vector<8x1xf32> to vector<8x4xf32>
    %33 = arith.divf %29, %32 : vector<8x4xf32>
    %34 = arith.truncf %33 : vector<8x4xf32> to vector<8x4xbf16>
    %cst_20 = arith.constant dense<0.000000e+00> : vector<8x8xf32>
    %35 = tpu.matmul %34, %23, %cst_20 {dimension_numbers = #tpu.dot_dimension_numbers<[1], [0], [0], [1], [0, 0, 1, 1], [], []>} : vector<8x4xbf16>, vector<4x8xbf16>, vector<8x8xf32> -> vector<8x8xf32>
    %c0_21 = arith.constant 0 : index
    %c0_22 = arith.constant 0 : index
    %c16 = arith.constant 16 : index
    %36 = vector.load %arg2[%c0_21, %c0_22, %c16] : memref<1x8x32xbf16, #tpu.memory_space<vmem>>, vector<1x8x8xbf16>
    %37 = vector.shape_cast %36 : vector<1x8x8xbf16> to vector<8x8xbf16>
    %c0_23 = arith.constant 0 : index
    %c0_24 = arith.constant 0 : index
    %c16_25 = arith.constant 16 : index
    %38 = vector.load %arg3[%c0_23, %c0_24, %c16_25] : memref<1x4x64xbf16, #tpu.memory_space<vmem>>, vector<1x4x8xbf16>
    %39 = vector.shape_cast %38 : vector<1x4x8xbf16> to vector<4x8xbf16>
    %c0_26 = arith.constant 0 : index
    %c0_27 = arith.constant 0 : index
    %c48 = arith.constant 48 : index
    %40 = vector.load %arg3[%c0_26, %c0_27, %c48] : memref<1x4x64xbf16, #tpu.memory_space<vmem>>, vector<1x4x8xbf16>
    %41 = vector.shape_cast %40 : vector<1x4x8xbf16> to vector<4x8xbf16>
    %cst_28 = arith.constant dense<0.000000e+00> : vector<8x4xf32>
    %42 = tpu.matmul %37, %39, %cst_28 {dimension_numbers = #tpu.dot_dimension_numbers<[1], [1], [0], [0], [0, 0, 1, 0], [], []>} : vector<8x8xbf16>, vector<4x8xbf16>, vector<8x4xf32> -> vector<8x4xf32>
    %cst_29 = arith.constant dense<0xFF800000> : vector<8xf32>
    %43 = vector.multi_reduction <maximumf>, %42, %cst_29 [1] : vector<8x4xf32> to vector<8xf32>
    %44 = vector.shape_cast %43 : vector<8xf32> to vector<8x1xf32>
    %45 = vector.broadcast %44 : vector<8x1xf32> to vector<8x4xf32>
    %46 = arith.subf %42, %45 : vector<8x4xf32>
    %47 = math.exp %46 : vector<8x4xf32>
    %cst_30 = arith.constant dense<0.000000e+00> : vector<8xf32>
    %48 = vector.multi_reduction <add>, %47, %cst_30 [1] : vector<8x4xf32> to vector<8xf32>
    %49 = vector.shape_cast %48 : vector<8xf32> to vector<8x1xf32>
    %50 = vector.broadcast %49 : vector<8x1xf32> to vector<8x4xf32>
    %51 = arith.divf %47, %50 : vector<8x4xf32>
    %52 = arith.truncf %51 : vector<8x4xf32> to vector<8x4xbf16>
    %cst_31 = arith.constant dense<0.000000e+00> : vector<8x8xf32>
    %53 = tpu.matmul %52, %41, %cst_31 {dimension_numbers = #tpu.dot_dimension_numbers<[1], [0], [0], [1], [0, 0, 1, 1], [], []>} : vector<8x4xbf16>, vector<4x8xbf16>, vector<8x8xf32> -> vector<8x8xf32>
    %c0_32 = arith.constant 0 : index
    %c0_33 = arith.constant 0 : index
    %c24 = arith.constant 24 : index
    %54 = vector.load %arg2[%c0_32, %c0_33, %c24] : memref<1x8x32xbf16, #tpu.memory_space<vmem>>, vector<1x8x8xbf16>
    %55 = vector.shape_cast %54 : vector<1x8x8xbf16> to vector<8x8xbf16>
    %c0_34 = arith.constant 0 : index
    %c0_35 = arith.constant 0 : index
    %c24_36 = arith.constant 24 : index
    %56 = vector.load %arg3[%c0_34, %c0_35, %c24_36] : memref<1x4x64xbf16, #tpu.memory_space<vmem>>, vector<1x4x8xbf16>
    %57 = vector.shape_cast %56 : vector<1x4x8xbf16> to vector<4x8xbf16>
    %c0_37 = arith.constant 0 : index
    %c0_38 = arith.constant 0 : index
    %c56 = arith.constant 56 : index
    %58 = vector.load %arg3[%c0_37, %c0_38, %c56] : memref<1x4x64xbf16, #tpu.memory_space<vmem>>, vector<1x4x8xbf16>
    %59 = vector.shape_cast %58 : vector<1x4x8xbf16> to vector<4x8xbf16>
    %cst_39 = arith.constant dense<0.000000e+00> : vector<8x4xf32>
    %60 = tpu.matmul %55, %57, %cst_39 {dimension_numbers = #tpu.dot_dimension_numbers<[1], [1], [0], [0], [0, 0, 1, 0], [], []>} : vector<8x8xbf16>, vector<4x8xbf16>, vector<8x4xf32> -> vector<8x4xf32>
    %cst_40 = arith.constant dense<0xFF800000> : vector<8xf32>
    %61 = vector.multi_reduction <maximumf>, %60, %cst_40 [1] : vector<8x4xf32> to vector<8xf32>
    %62 = vector.shape_cast %61 : vector<8xf32> to vector<8x1xf32>
    %63 = vector.broadcast %62 : vector<8x1xf32> to vector<8x4xf32>
    %64 = arith.subf %60, %63 : vector<8x4xf32>
    %65 = math.exp %64 : vector<8x4xf32>
    %cst_41 = arith.constant dense<0.000000e+00> : vector<8xf32>
    %66 = vector.multi_reduction <add>, %65, %cst_41 [1] : vector<8x4xf32> to vector<8xf32>
    %67 = vector.shape_cast %66 : vector<8xf32> to vector<8x1xf32>
    %68 = vector.broadcast %67 : vector<8x1xf32> to vector<8x4xf32>
    %69 = arith.divf %65, %68 : vector<8x4xf32>
    %70 = arith.truncf %69 : vector<8x4xf32> to vector<8x4xbf16>
    %cst_42 = arith.constant dense<0.000000e+00> : vector<8x8xf32>
    %71 = tpu.matmul %70, %59, %cst_42 {dimension_numbers = #tpu.dot_dimension_numbers<[1], [0], [0], [1], [0, 0, 1, 1], [], []>} : vector<8x4xbf16>, vector<4x8xbf16>, vector<8x8xf32> -> vector<8x8xf32>
    %72 = tpu.concatenate %17, %35, %53, %71 in 1 : vector<8x8xf32>, vector<8x8xf32>, vector<8x8xf32>, vector<8x8xf32> -> vector<8x32xf32>
    %73 = arith.truncf %72 : vector<8x32xf32> to vector<8x32xbf16>
    %c0_43 = arith.constant 0 : index
    %c0_44 = arith.constant 0 : index
    %c0_45 = arith.constant 0 : index
    %74 = vector.load %arg4[%c0_43, %c0_44, %c0_45] : memref<1x8x32xbf16, #tpu.memory_space<vmem>>, vector<1x8x32xbf16>
    %75 = vector.shape_cast %74 : vector<1x8x32xbf16> to vector<8x32xbf16>
    %76 = vector.shape_cast %73 : vector<8x32xbf16> to vector<1x8x32xbf16>
    tpu.vector_store %arg4[%c0_43, %c0_44, %c0_45], %76 {strides = array<i32>} : memref<1x8x32xbf16, #tpu.memory_space<vmem>>, vector<1x8x32xbf16>,
    %77 = tpu.concatenate %15, %33, %51, %69 in 1 : vector<8x4xf32>, vector<8x4xf32>, vector<8x4xf32>, vector<8x4xf32> -> vector<8x16xf32>
    %c0_46 = arith.constant 0 : index
    %c0_47 = arith.constant 0 : index
    %c0_48 = arith.constant 0 : index
    %78 = vector.load %arg5[%c0_46, %c0_47, %c0_48] : memref<1x8x16xf32, #tpu.memory_space<vmem>>, vector<1x8x16xf32>
    %79 = vector.shape_cast %78 : vector<1x8x16xf32> to vector<8x16xf32>
    %80 = vector.shape_cast %77 : vector<8x16xf32> to vector<1x8x16xf32>
    tpu.vector_store %arg5[%c0_46, %c0_47, %c0_48], %80 {strides = array<i32>} : memref<1x8x16xf32, #tpu.memory_space<vmem>>, vector<1x8x16xf32>,
    return
  }
  func.func @transform_0(%arg0: i32, %arg1: i32) -> (i32, i32, i32) {
    %c0_i32 = arith.constant 0 : i32
    %c0_i32_0 = arith.constant 0 : i32
    return %arg0, %arg1, %c0_i32 : i32, i32, i32
  }
  func.func @transform_1(%arg0: i32, %arg1: i32) -> (i32, i32, i32) {
    %c0_i32 = arith.constant 0 : i32
    %c0_i32_0 = arith.constant 0 : i32
    %c0_i32_1 = arith.constant 0 : i32
    return %arg0, %c0_i32, %c0_i32_0 : i32, i32, i32
  }
  func.func @transform_2(%arg0: i32, %arg1: i32) -> (i32, i32, i32) {
    %c0_i32 = arith.constant 0 : i32
    %c0_i32_0 = arith.constant 0 : i32
    return %arg0, %arg1, %c0_i32 : i32, i32, i32
  }
  func.func @transform_3(%arg0: i32, %arg1: i32) -> (i32, i32, i32) {
    %c0_i32 = arith.constant 0 : i32
    %c0_i32_0 = arith.constant 0 : i32
    return %arg0, %arg1, %c0_i32 : i32, i32, i32
  }
}

module attributes {stable_mosaic.version = 11 : i64} {
  func.func @_extract_attn_kernel(%arg0: i32, %arg1: memref<4x32xbf16, #tpu.memory_space<vmem>>, %arg2: memref<1x8x64xbf16, #tpu.memory_space<vmem>>, %arg3: memref<1x1x8xi32, #tpu.memory_space<vmem>>, %arg4: memref<1x4x32xbf16, #tpu.memory_space<vmem>>, %arg5: memref<1x4x4x8xf32, #tpu.memory_space<vmem>>) attributes {dimension_semantics = [#tpu.dimension_semantics<parallel>], iteration_bounds = array<i64: 2>, scalar_prefetch = 0 : i64, scratch_operands = 0 : i64, tpu.core_type = #tpu.core_type<tc>, window_params = [{pipeline_mode = #tpu.pipeline_mode<synchronous>, transform_indices = @transform_0, window_bounds = array<i64: 4, 32>}, {transform_indices = @transform_1, window_bounds = array<i64: 1, 8, 64>}, {transform_indices = @transform_2, window_bounds = array<i64: 1, 1, 8>}, {transform_indices = @transform_3, window_bounds = array<i64: 1, 4, 32>}, {transform_indices = @transform_4, window_bounds = array<i64: 1, 4, 4, 8>}]} {
    %c0 = arith.constant 0 : index
    %c0_0 = arith.constant 0 : index
    %c0_1 = arith.constant 0 : index
    %0 = vector.load %arg3[%c0, %c0_0, %c0_1] : memref<1x1x8xi32, #tpu.memory_space<vmem>>, vector<1x1x8xi32>
    %1 = vector.shape_cast %0 : vector<1x1x8xi32> to vector<1x8xi32>
    %c0_i32 = arith.constant 0 : i32
    %2 = vector.broadcast %c0_i32 : i32 to vector<1x8xi32>
    %3 = arith.cmpi sgt, %1, %2 : vector<1x8xi32>
    %c0_2 = arith.constant 0 : index
    %c0_3 = arith.constant 0 : index
    %4 = vector.load %arg1[%c0_2, %c0_3] : memref<4x32xbf16, #tpu.memory_space<vmem>>, vector<4x8xbf16>
    %c0_4 = arith.constant 0 : index
    %c0_5 = arith.constant 0 : index
    %c0_6 = arith.constant 0 : index
    %5 = vector.load %arg2[%c0_4, %c0_5, %c0_6] : memref<1x8x64xbf16, #tpu.memory_space<vmem>>, vector<1x8x8xbf16>
    %6 = vector.shape_cast %5 : vector<1x8x8xbf16> to vector<8x8xbf16>
    %c0_7 = arith.constant 0 : index
    %c0_8 = arith.constant 0 : index
    %c32 = arith.constant 32 : index
    %7 = vector.load %arg2[%c0_7, %c0_8, %c32] : memref<1x8x64xbf16, #tpu.memory_space<vmem>>, vector<1x8x8xbf16>
    %8 = vector.shape_cast %7 : vector<1x8x8xbf16> to vector<8x8xbf16>
    %cst = arith.constant dense<0.000000e+00> : vector<4x8xf32>
    %9 = tpu.matmul %4, %6, %cst {dimension_numbers = #tpu.dot_dimension_numbers<[1], [1], [0], [0], [0, 0, 1, 0], [], []>} : vector<4x8xbf16>, vector<8x8xbf16>, vector<4x8xf32> -> vector<4x8xf32>
    %cst_9 = arith.constant -1.000000e+09 : f32
    %10 = vector.shape_cast %3 : vector<1x8xi1> to vector<1x8xi1>
    %11 = vector.broadcast %10 : vector<1x8xi1> to vector<4x8xi1>
    %12 = vector.broadcast %cst_9 : f32 to vector<4x8xf32>
    %13 = arith.select %11, %9, %12 : vector<4x8xi1>, vector<4x8xf32>
    %cst_10 = arith.constant dense<0xFF800000> : vector<4xf32>
    %14 = vector.multi_reduction <maximumf>, %13, %cst_10 [1] : vector<4x8xf32> to vector<4xf32>
    %15 = vector.shape_cast %14 : vector<4xf32> to vector<4x1xf32>
    %16 = vector.broadcast %15 : vector<4x1xf32> to vector<4x8xf32>
    %17 = arith.subf %13, %16 : vector<4x8xf32>
    %18 = math.exp %17 : vector<4x8xf32>
    %cst_11 = arith.constant dense<0.000000e+00> : vector<4xf32>
    %19 = vector.multi_reduction <add>, %18, %cst_11 [1] : vector<4x8xf32> to vector<4xf32>
    %20 = vector.shape_cast %19 : vector<4xf32> to vector<4x1xf32>
    %21 = vector.broadcast %20 : vector<4x1xf32> to vector<4x8xf32>
    %22 = arith.divf %18, %21 : vector<4x8xf32>
    %c0_12 = arith.constant 0 : index
    %c0_13 = arith.constant 0 : index
    %c0_14 = arith.constant 0 : index
    %c0_15 = arith.constant 0 : index
    %23 = vector.load %arg5[%c0_12, %c0_13, %c0_14, %c0_15] : memref<1x4x4x8xf32, #tpu.memory_space<vmem>>, vector<1x1x4x8xf32>
    %24 = vector.shape_cast %23 : vector<1x1x4x8xf32> to vector<4x8xf32>
    %25 = vector.shape_cast %22 : vector<4x8xf32> to vector<1x1x4x8xf32>
    tpu.vector_store %arg5[%c0_12, %c0_13, %c0_14, %c0_15], %25 {strides = array<i32>} : memref<1x4x4x8xf32, #tpu.memory_space<vmem>>, vector<1x1x4x8xf32>,
    %26 = arith.truncf %22 : vector<4x8xf32> to vector<4x8xbf16>
    %cst_16 = arith.constant dense<0.000000e+00> : vector<4x8xf32>
    %27 = tpu.matmul %26, %8, %cst_16 {dimension_numbers = #tpu.dot_dimension_numbers<[1], [0], [0], [1], [0, 0, 1, 1], [], []>} : vector<4x8xbf16>, vector<8x8xbf16>, vector<4x8xf32> -> vector<4x8xf32>
    %c0_17 = arith.constant 0 : index
    %c8 = arith.constant 8 : index
    %28 = vector.load %arg1[%c0_17, %c8] : memref<4x32xbf16, #tpu.memory_space<vmem>>, vector<4x8xbf16>
    %c0_18 = arith.constant 0 : index
    %c0_19 = arith.constant 0 : index
    %c8_20 = arith.constant 8 : index
    %29 = vector.load %arg2[%c0_18, %c0_19, %c8_20] : memref<1x8x64xbf16, #tpu.memory_space<vmem>>, vector<1x8x8xbf16>
    %30 = vector.shape_cast %29 : vector<1x8x8xbf16> to vector<8x8xbf16>
    %c0_21 = arith.constant 0 : index
    %c0_22 = arith.constant 0 : index
    %c40 = arith.constant 40 : index
    %31 = vector.load %arg2[%c0_21, %c0_22, %c40] : memref<1x8x64xbf16, #tpu.memory_space<vmem>>, vector<1x8x8xbf16>
    %32 = vector.shape_cast %31 : vector<1x8x8xbf16> to vector<8x8xbf16>
    %cst_23 = arith.constant dense<0.000000e+00> : vector<4x8xf32>
    %33 = tpu.matmul %28, %30, %cst_23 {dimension_numbers = #tpu.dot_dimension_numbers<[1], [1], [0], [0], [0, 0, 1, 0], [], []>} : vector<4x8xbf16>, vector<8x8xbf16>, vector<4x8xf32> -> vector<4x8xf32>
    %cst_24 = arith.constant -1.000000e+09 : f32
    %34 = vector.shape_cast %3 : vector<1x8xi1> to vector<1x8xi1>
    %35 = vector.broadcast %34 : vector<1x8xi1> to vector<4x8xi1>
    %36 = vector.broadcast %cst_24 : f32 to vector<4x8xf32>
    %37 = arith.select %35, %33, %36 : vector<4x8xi1>, vector<4x8xf32>
    %cst_25 = arith.constant dense<0xFF800000> : vector<4xf32>
    %38 = vector.multi_reduction <maximumf>, %37, %cst_25 [1] : vector<4x8xf32> to vector<4xf32>
    %39 = vector.shape_cast %38 : vector<4xf32> to vector<4x1xf32>
    %40 = vector.broadcast %39 : vector<4x1xf32> to vector<4x8xf32>
    %41 = arith.subf %37, %40 : vector<4x8xf32>
    %42 = math.exp %41 : vector<4x8xf32>
    %cst_26 = arith.constant dense<0.000000e+00> : vector<4xf32>
    %43 = vector.multi_reduction <add>, %42, %cst_26 [1] : vector<4x8xf32> to vector<4xf32>
    %44 = vector.shape_cast %43 : vector<4xf32> to vector<4x1xf32>
    %45 = vector.broadcast %44 : vector<4x1xf32> to vector<4x8xf32>
    %46 = arith.divf %42, %45 : vector<4x8xf32>
    %c0_27 = arith.constant 0 : index
    %c1 = arith.constant 1 : index
    %c0_28 = arith.constant 0 : index
    %c0_29 = arith.constant 0 : index
    %47 = vector.load %arg5[%c0_27, %c1, %c0_28, %c0_29] : memref<1x4x4x8xf32, #tpu.memory_space<vmem>>, vector<1x1x4x8xf32>
    %48 = vector.shape_cast %47 : vector<1x1x4x8xf32> to vector<4x8xf32>
    %49 = vector.shape_cast %46 : vector<4x8xf32> to vector<1x1x4x8xf32>
    tpu.vector_store %arg5[%c0_27, %c1, %c0_28, %c0_29], %49 {strides = array<i32>} : memref<1x4x4x8xf32, #tpu.memory_space<vmem>>, vector<1x1x4x8xf32>,
    %50 = arith.truncf %46 : vector<4x8xf32> to vector<4x8xbf16>
    %cst_30 = arith.constant dense<0.000000e+00> : vector<4x8xf32>
    %51 = tpu.matmul %50, %32, %cst_30 {dimension_numbers = #tpu.dot_dimension_numbers<[1], [0], [0], [1], [0, 0, 1, 1], [], []>} : vector<4x8xbf16>, vector<8x8xbf16>, vector<4x8xf32> -> vector<4x8xf32>
    %c0_31 = arith.constant 0 : index
    %c16 = arith.constant 16 : index
    %52 = vector.load %arg1[%c0_31, %c16] : memref<4x32xbf16, #tpu.memory_space<vmem>>, vector<4x8xbf16>
    %c0_32 = arith.constant 0 : index
    %c0_33 = arith.constant 0 : index
    %c16_34 = arith.constant 16 : index
    %53 = vector.load %arg2[%c0_32, %c0_33, %c16_34] : memref<1x8x64xbf16, #tpu.memory_space<vmem>>, vector<1x8x8xbf16>
    %54 = vector.shape_cast %53 : vector<1x8x8xbf16> to vector<8x8xbf16>
    %c0_35 = arith.constant 0 : index
    %c0_36 = arith.constant 0 : index
    %c48 = arith.constant 48 : index
    %55 = vector.load %arg2[%c0_35, %c0_36, %c48] : memref<1x8x64xbf16, #tpu.memory_space<vmem>>, vector<1x8x8xbf16>
    %56 = vector.shape_cast %55 : vector<1x8x8xbf16> to vector<8x8xbf16>
    %cst_37 = arith.constant dense<0.000000e+00> : vector<4x8xf32>
    %57 = tpu.matmul %52, %54, %cst_37 {dimension_numbers = #tpu.dot_dimension_numbers<[1], [1], [0], [0], [0, 0, 1, 0], [], []>} : vector<4x8xbf16>, vector<8x8xbf16>, vector<4x8xf32> -> vector<4x8xf32>
    %cst_38 = arith.constant -1.000000e+09 : f32
    %58 = vector.shape_cast %3 : vector<1x8xi1> to vector<1x8xi1>
    %59 = vector.broadcast %58 : vector<1x8xi1> to vector<4x8xi1>
    %60 = vector.broadcast %cst_38 : f32 to vector<4x8xf32>
    %61 = arith.select %59, %57, %60 : vector<4x8xi1>, vector<4x8xf32>
    %cst_39 = arith.constant dense<0xFF800000> : vector<4xf32>
    %62 = vector.multi_reduction <maximumf>, %61, %cst_39 [1] : vector<4x8xf32> to vector<4xf32>
    %63 = vector.shape_cast %62 : vector<4xf32> to vector<4x1xf32>
    %64 = vector.broadcast %63 : vector<4x1xf32> to vector<4x8xf32>
    %65 = arith.subf %61, %64 : vector<4x8xf32>
    %66 = math.exp %65 : vector<4x8xf32>
    %cst_40 = arith.constant dense<0.000000e+00> : vector<4xf32>
    %67 = vector.multi_reduction <add>, %66, %cst_40 [1] : vector<4x8xf32> to vector<4xf32>
    %68 = vector.shape_cast %67 : vector<4xf32> to vector<4x1xf32>
    %69 = vector.broadcast %68 : vector<4x1xf32> to vector<4x8xf32>
    %70 = arith.divf %66, %69 : vector<4x8xf32>
    %c0_41 = arith.constant 0 : index
    %c2 = arith.constant 2 : index
    %c0_42 = arith.constant 0 : index
    %c0_43 = arith.constant 0 : index
    %71 = vector.load %arg5[%c0_41, %c2, %c0_42, %c0_43] : memref<1x4x4x8xf32, #tpu.memory_space<vmem>>, vector<1x1x4x8xf32>
    %72 = vector.shape_cast %71 : vector<1x1x4x8xf32> to vector<4x8xf32>
    %73 = vector.shape_cast %70 : vector<4x8xf32> to vector<1x1x4x8xf32>
    tpu.vector_store %arg5[%c0_41, %c2, %c0_42, %c0_43], %73 {strides = array<i32>} : memref<1x4x4x8xf32, #tpu.memory_space<vmem>>, vector<1x1x4x8xf32>,
    %74 = arith.truncf %70 : vector<4x8xf32> to vector<4x8xbf16>
    %cst_44 = arith.constant dense<0.000000e+00> : vector<4x8xf32>
    %75 = tpu.matmul %74, %56, %cst_44 {dimension_numbers = #tpu.dot_dimension_numbers<[1], [0], [0], [1], [0, 0, 1, 1], [], []>} : vector<4x8xbf16>, vector<8x8xbf16>, vector<4x8xf32> -> vector<4x8xf32>
    %c0_45 = arith.constant 0 : index
    %c24 = arith.constant 24 : index
    %76 = vector.load %arg1[%c0_45, %c24] : memref<4x32xbf16, #tpu.memory_space<vmem>>, vector<4x8xbf16>
    %c0_46 = arith.constant 0 : index
    %c0_47 = arith.constant 0 : index
    %c24_48 = arith.constant 24 : index
    %77 = vector.load %arg2[%c0_46, %c0_47, %c24_48] : memref<1x8x64xbf16, #tpu.memory_space<vmem>>, vector<1x8x8xbf16>
    %78 = vector.shape_cast %77 : vector<1x8x8xbf16> to vector<8x8xbf16>
    %c0_49 = arith.constant 0 : index
    %c0_50 = arith.constant 0 : index
    %c56 = arith.constant 56 : index
    %79 = vector.load %arg2[%c0_49, %c0_50, %c56] : memref<1x8x64xbf16, #tpu.memory_space<vmem>>, vector<1x8x8xbf16>
    %80 = vector.shape_cast %79 : vector<1x8x8xbf16> to vector<8x8xbf16>
    %cst_51 = arith.constant dense<0.000000e+00> : vector<4x8xf32>
    %81 = tpu.matmul %76, %78, %cst_51 {dimension_numbers = #tpu.dot_dimension_numbers<[1], [1], [0], [0], [0, 0, 1, 0], [], []>} : vector<4x8xbf16>, vector<8x8xbf16>, vector<4x8xf32> -> vector<4x8xf32>
    %cst_52 = arith.constant -1.000000e+09 : f32
    %82 = vector.shape_cast %3 : vector<1x8xi1> to vector<1x8xi1>
    %83 = vector.broadcast %82 : vector<1x8xi1> to vector<4x8xi1>
    %84 = vector.broadcast %cst_52 : f32 to vector<4x8xf32>
    %85 = arith.select %83, %81, %84 : vector<4x8xi1>, vector<4x8xf32>
    %cst_53 = arith.constant dense<0xFF800000> : vector<4xf32>
    %86 = vector.multi_reduction <maximumf>, %85, %cst_53 [1] : vector<4x8xf32> to vector<4xf32>
    %87 = vector.shape_cast %86 : vector<4xf32> to vector<4x1xf32>
    %88 = vector.broadcast %87 : vector<4x1xf32> to vector<4x8xf32>
    %89 = arith.subf %85, %88 : vector<4x8xf32>
    %90 = math.exp %89 : vector<4x8xf32>
    %cst_54 = arith.constant dense<0.000000e+00> : vector<4xf32>
    %91 = vector.multi_reduction <add>, %90, %cst_54 [1] : vector<4x8xf32> to vector<4xf32>
    %92 = vector.shape_cast %91 : vector<4xf32> to vector<4x1xf32>
    %93 = vector.broadcast %92 : vector<4x1xf32> to vector<4x8xf32>
    %94 = arith.divf %90, %93 : vector<4x8xf32>
    %c0_55 = arith.constant 0 : index
    %c3 = arith.constant 3 : index
    %c0_56 = arith.constant 0 : index
    %c0_57 = arith.constant 0 : index
    %95 = vector.load %arg5[%c0_55, %c3, %c0_56, %c0_57] : memref<1x4x4x8xf32, #tpu.memory_space<vmem>>, vector<1x1x4x8xf32>
    %96 = vector.shape_cast %95 : vector<1x1x4x8xf32> to vector<4x8xf32>
    %97 = vector.shape_cast %94 : vector<4x8xf32> to vector<1x1x4x8xf32>
    tpu.vector_store %arg5[%c0_55, %c3, %c0_56, %c0_57], %97 {strides = array<i32>} : memref<1x4x4x8xf32, #tpu.memory_space<vmem>>, vector<1x1x4x8xf32>,
    %98 = arith.truncf %94 : vector<4x8xf32> to vector<4x8xbf16>
    %cst_58 = arith.constant dense<0.000000e+00> : vector<4x8xf32>
    %99 = tpu.matmul %98, %80, %cst_58 {dimension_numbers = #tpu.dot_dimension_numbers<[1], [0], [0], [1], [0, 0, 1, 1], [], []>} : vector<4x8xbf16>, vector<8x8xbf16>, vector<4x8xf32> -> vector<4x8xf32>
    %100 = tpu.concatenate %27, %51, %75, %99 in 1 : vector<4x8xf32>, vector<4x8xf32>, vector<4x8xf32>, vector<4x8xf32> -> vector<4x32xf32>
    %101 = arith.truncf %100 : vector<4x32xf32> to vector<4x32xbf16>
    %c0_59 = arith.constant 0 : index
    %c0_60 = arith.constant 0 : index
    %c0_61 = arith.constant 0 : index
    %102 = vector.load %arg4[%c0_59, %c0_60, %c0_61] : memref<1x4x32xbf16, #tpu.memory_space<vmem>>, vector<1x4x32xbf16>
    %103 = vector.shape_cast %102 : vector<1x4x32xbf16> to vector<4x32xbf16>
    %104 = vector.shape_cast %101 : vector<4x32xbf16> to vector<1x4x32xbf16>
    tpu.vector_store %arg4[%c0_59, %c0_60, %c0_61], %104 {strides = array<i32>} : memref<1x4x32xbf16, #tpu.memory_space<vmem>>, vector<1x4x32xbf16>,
    return
  }
  func.func @transform_0(%arg0: i32) -> (i32, i32) {
    %c0_i32 = arith.constant 0 : i32
    %c0_i32_0 = arith.constant 0 : i32
    %c0_i32_1 = arith.constant 0 : i32
    return %c0_i32, %c0_i32_0 : i32, i32
  }
  func.func @transform_1(%arg0: i32) -> (i32, i32, i32) {
    %c0_i32 = arith.constant 0 : i32
    %c0_i32_0 = arith.constant 0 : i32
    %c0_i32_1 = arith.constant 0 : i32
    return %arg0, %c0_i32, %c0_i32_0 : i32, i32, i32
  }
  func.func @transform_2(%arg0: i32) -> (i32, i32, i32) {
    %c0_i32 = arith.constant 0 : i32
    %c0_i32_0 = arith.constant 0 : i32
    %c0_i32_1 = arith.constant 0 : i32
    return %arg0, %c0_i32, %c0_i32_0 : i32, i32, i32
  }
  func.func @transform_3(%arg0: i32) -> (i32, i32, i32) {
    %c0_i32 = arith.constant 0 : i32
    %c0_i32_0 = arith.constant 0 : i32
    %c0_i32_1 = arith.constant 0 : i32
    return %arg0, %c0_i32, %c0_i32_0 : i32, i32, i32
  }
  func.func @transform_4(%arg0: i32) -> (i32, i32, i32, i32) {
    %c0_i32 = arith.constant 0 : i32
    %c0_i32_0 = arith.constant 0 : i32
    %c0_i32_1 = arith.constant 0 : i32
    %c0_i32_2 = arith.constant 0 : i32
    return %arg0, %c0_i32, %c0_i32_0, %c0_i32_1 : i32, i32, i32, i32
  }
}

module attributes {stable_mosaic.version = 11 : i64} {
  func.func @_router_proj_kernel(%arg0: i32, %arg1: memref<8x32xbf16, #tpu.memory_space<vmem>>, %arg2: memref<32x32xbf16, #tpu.memory_space<vmem>>, %arg3: memref<1x32xf32, #tpu.memory_space<vmem>>, %arg4: memref<32x64xbf16, #tpu.memory_space<vmem>>, %arg5: memref<1x64xf32, #tpu.memory_space<vmem>>, %arg6: memref<8x32xf32, #tpu.memory_space<vmem>>, %arg7: memref<8x64xbf16, #tpu.memory_space<vmem>>) attributes {dimension_semantics = [#tpu.dimension_semantics<arbitrary>], iteration_bounds = array<i64: 1>, scalar_prefetch = 0 : i64, scratch_operands = 0 : i64, tpu.core_type = #tpu.core_type<tc>, window_params = [{pipeline_mode = #tpu.pipeline_mode<synchronous>, transform_indices = @transform_0, window_bounds = array<i64: 8, 32>}, {pipeline_mode = #tpu.pipeline_mode<synchronous>, transform_indices = @transform_1, window_bounds = array<i64: 32, 32>}, {pipeline_mode = #tpu.pipeline_mode<synchronous>, transform_indices = @transform_2, window_bounds = array<i64: 1, 32>}, {pipeline_mode = #tpu.pipeline_mode<synchronous>, transform_indices = @transform_3, window_bounds = array<i64: 32, 64>}, {pipeline_mode = #tpu.pipeline_mode<synchronous>, transform_indices = @transform_4, window_bounds = array<i64: 1, 64>}, {pipeline_mode = #tpu.pipeline_mode<synchronous>, transform_indices = @transform_5, window_bounds = array<i64: 8, 32>}, {pipeline_mode = #tpu.pipeline_mode<synchronous>, transform_indices = @transform_6, window_bounds = array<i64: 8, 64>}]} {
    %c0 = arith.constant 0 : index
    %c0_0 = arith.constant 0 : index
    %0 = vector.load %arg1[%c0, %c0_0] : memref<8x32xbf16, #tpu.memory_space<vmem>>, vector<8x32xbf16>
    %c0_1 = arith.constant 0 : index
    %c0_2 = arith.constant 0 : index
    %1 = vector.load %arg2[%c0_1, %c0_2] : memref<32x32xbf16, #tpu.memory_space<vmem>>, vector<32x32xbf16>
    %cst = arith.constant dense<0.000000e+00> : vector<8x32xf32>
    %2 = tpu.matmul %0, %1, %cst {dimension_numbers = #tpu.dot_dimension_numbers<[1], [0], [0], [1], [0, 0, 1, 1], [], []>} : vector<8x32xbf16>, vector<32x32xbf16>, vector<8x32xf32> -> vector<8x32xf32>
    %c0_3 = arith.constant 0 : index
    %c0_4 = arith.constant 0 : index
    %3 = vector.load %arg3[%c0_3, %c0_4] : memref<1x32xf32, #tpu.memory_space<vmem>>, vector<1x32xf32>
    %4 = vector.broadcast %3 : vector<1x32xf32> to vector<8x32xf32>
    %5 = arith.addf %2, %4 : vector<8x32xf32>
    %c0_5 = arith.constant 0 : index
    %c0_6 = arith.constant 0 : index
    %6 = vector.load %arg6[%c0_5, %c0_6] : memref<8x32xf32, #tpu.memory_space<vmem>>, vector<8x32xf32>
    tpu.vector_store %arg6[%c0_5, %c0_6], %5 {strides = array<i32>} : memref<8x32xf32, #tpu.memory_space<vmem>>, vector<8x32xf32>,
    %7 = arith.truncf %5 : vector<8x32xf32> to vector<8x32xbf16>
    %c0_7 = arith.constant 0 : index
    %c0_8 = arith.constant 0 : index
    %8 = vector.load %arg4[%c0_7, %c0_8] : memref<32x64xbf16, #tpu.memory_space<vmem>>, vector<32x64xbf16>
    %cst_9 = arith.constant dense<0.000000e+00> : vector<8x64xf32>
    %9 = tpu.matmul %7, %8, %cst_9 {dimension_numbers = #tpu.dot_dimension_numbers<[1], [0], [0], [1], [0, 0, 1, 1], [], []>} : vector<8x32xbf16>, vector<32x64xbf16>, vector<8x64xf32> -> vector<8x64xf32>
    %c0_10 = arith.constant 0 : index
    %c0_11 = arith.constant 0 : index
    %10 = vector.load %arg5[%c0_10, %c0_11] : memref<1x64xf32, #tpu.memory_space<vmem>>, vector<1x64xf32>
    %11 = vector.broadcast %10 : vector<1x64xf32> to vector<8x64xf32>
    %12 = arith.addf %9, %11 : vector<8x64xf32>
    %13 = arith.truncf %12 : vector<8x64xf32> to vector<8x64xbf16>
    %c0_12 = arith.constant 0 : index
    %c0_13 = arith.constant 0 : index
    %14 = vector.load %arg7[%c0_12, %c0_13] : memref<8x64xbf16, #tpu.memory_space<vmem>>, vector<8x64xbf16>
    tpu.vector_store %arg7[%c0_12, %c0_13], %13 {strides = array<i32>} : memref<8x64xbf16, #tpu.memory_space<vmem>>, vector<8x64xbf16>,
    return
  }
  func.func @transform_0(%arg0: i32) -> (i32, i32) {
    %c0_i32 = arith.constant 0 : i32
    %c0_i32_0 = arith.constant 0 : i32
    %c0_i32_1 = arith.constant 0 : i32
    return %c0_i32, %c0_i32_0 : i32, i32
  }
  func.func @transform_1(%arg0: i32) -> (i32, i32) {
    %c0_i32 = arith.constant 0 : i32
    %c0_i32_0 = arith.constant 0 : i32
    %c0_i32_1 = arith.constant 0 : i32
    return %c0_i32, %c0_i32_0 : i32, i32
  }
  func.func @transform_2(%arg0: i32) -> (i32, i32) {
    %c0_i32 = arith.constant 0 : i32
    %c0_i32_0 = arith.constant 0 : i32
    %c0_i32_1 = arith.constant 0 : i32
    return %c0_i32, %c0_i32_0 : i32, i32
  }
  func.func @transform_3(%arg0: i32) -> (i32, i32) {
    %c0_i32 = arith.constant 0 : i32
    %c0_i32_0 = arith.constant 0 : i32
    %c0_i32_1 = arith.constant 0 : i32
    return %c0_i32, %c0_i32_0 : i32, i32
  }
  func.func @transform_4(%arg0: i32) -> (i32, i32) {
    %c0_i32 = arith.constant 0 : i32
    %c0_i32_0 = arith.constant 0 : i32
    %c0_i32_1 = arith.constant 0 : i32
    return %c0_i32, %c0_i32_0 : i32, i32
  }
  func.func @transform_5(%arg0: i32) -> (i32, i32) {
    %c0_i32 = arith.constant 0 : i32
    %c0_i32_0 = arith.constant 0 : i32
    %c0_i32_1 = arith.constant 0 : i32
    return %c0_i32, %c0_i32_0 : i32, i32
  }
  func.func @transform_6(%arg0: i32) -> (i32, i32) {
    %c0_i32 = arith.constant 0 : i32
    %c0_i32_0 = arith.constant 0 : i32
    %c0_i32_1 = arith.constant 0 : i32
    return %c0_i32, %c0_i32_0 : i32, i32
  }
}

module attributes {stable_mosaic.version = 11 : i64} {
  func.func @_ln_kvq_kernel(%arg0: i32, %arg1: memref<16x32xf32, #tpu.memory_space<vmem>>, %arg2: memref<1x32xf32, #tpu.memory_space<vmem>>, %arg3: memref<1x32xf32, #tpu.memory_space<vmem>>, %arg4: memref<32x96xbf16, #tpu.memory_space<vmem>>, %arg5: memref<1x96xf32, #tpu.memory_space<vmem>>, %arg6: memref<16x64xbf16, #tpu.memory_space<vmem>>, %arg7: memref<16x32xbf16, #tpu.memory_space<vmem>>) attributes {dimension_semantics = [#tpu.dimension_semantics<parallel>], iteration_bounds = array<i64: 1>, scalar_prefetch = 0 : i64, scratch_operands = 0 : i64, tpu.core_type = #tpu.core_type<tc>, window_params = [{transform_indices = @transform_0, window_bounds = array<i64: 16, 32>}, {pipeline_mode = #tpu.pipeline_mode<synchronous>, transform_indices = @transform_1, window_bounds = array<i64: 1, 32>}, {pipeline_mode = #tpu.pipeline_mode<synchronous>, transform_indices = @transform_2, window_bounds = array<i64: 1, 32>}, {pipeline_mode = #tpu.pipeline_mode<synchronous>, transform_indices = @transform_3, window_bounds = array<i64: 32, 96>}, {pipeline_mode = #tpu.pipeline_mode<synchronous>, transform_indices = @transform_4, window_bounds = array<i64: 1, 96>}, {transform_indices = @transform_5, window_bounds = array<i64: 16, 64>}, {transform_indices = @transform_6, window_bounds = array<i64: 16, 32>}]} {
    %c0 = arith.constant 0 : index
    %c0_0 = arith.constant 0 : index
    %0 = vector.load %arg1[%c0, %c0_0] : memref<16x32xf32, #tpu.memory_space<vmem>>, vector<16x32xf32>
    %c0_1 = arith.constant 0 : index
    %c0_2 = arith.constant 0 : index
    %1 = vector.load %arg2[%c0_1, %c0_2] : memref<1x32xf32, #tpu.memory_space<vmem>>, vector<1x32xf32>
    %c0_3 = arith.constant 0 : index
    %c0_4 = arith.constant 0 : index
    %2 = vector.load %arg3[%c0_3, %c0_4] : memref<1x32xf32, #tpu.memory_space<vmem>>, vector<1x32xf32>
    %cst = arith.constant dense<0.000000e+00> : vector<16xf32>
    %3 = vector.multi_reduction <add>, %0, %cst [1] : vector<16x32xf32> to vector<16xf32>
    %4 = vector.shape_cast %3 : vector<16xf32> to vector<16x1xf32>
    %cst_5 = arith.constant 3.200000e+01 : f32
    %5 = vector.broadcast %cst_5 : f32 to vector<16x1xf32>
    %6 = arith.divf %4, %5 : vector<16x1xf32>
    %7 = vector.broadcast %6 : vector<16x1xf32> to vector<16x32xf32>
    %8 = arith.subf %0, %7 : vector<16x32xf32>
    %9 = arith.mulf %8, %8 : vector<16x32xf32>
    %cst_6 = arith.constant dense<0.000000e+00> : vector<16xf32>
    %10 = vector.multi_reduction <add>, %9, %cst_6 [1] : vector<16x32xf32> to vector<16xf32>
    %11 = vector.shape_cast %10 : vector<16xf32> to vector<16x1xf32>
    %cst_7 = arith.constant 3.200000e+01 : f32
    %12 = vector.broadcast %cst_7 : f32 to vector<16x1xf32>
    %13 = arith.divf %11, %12 : vector<16x1xf32>
    %14 = vector.broadcast %6 : vector<16x1xf32> to vector<16x32xf32>
    %15 = arith.subf %0, %14 : vector<16x32xf32>
    %cst_8 = arith.constant 9.99999997E-7 : f32
    %16 = vector.broadcast %cst_8 : f32 to vector<16x1xf32>
    %17 = arith.addf %13, %16 : vector<16x1xf32>
    %18 = math.rsqrt %17 : vector<16x1xf32>
    %19 = vector.broadcast %18 : vector<16x1xf32> to vector<16x32xf32>
    %20 = arith.mulf %15, %19 : vector<16x32xf32>
    %21 = vector.broadcast %1 : vector<1x32xf32> to vector<16x32xf32>
    %22 = arith.mulf %20, %21 : vector<16x32xf32>
    %23 = vector.broadcast %2 : vector<1x32xf32> to vector<16x32xf32>
    %24 = arith.addf %22, %23 : vector<16x32xf32>
    %25 = arith.truncf %24 : vector<16x32xf32> to vector<16x32xbf16>
    %c0_9 = arith.constant 0 : index
    %c0_10 = arith.constant 0 : index
    %26 = vector.load %arg4[%c0_9, %c0_10] : memref<32x96xbf16, #tpu.memory_space<vmem>>, vector<32x96xbf16>
    %cst_11 = arith.constant dense<0.000000e+00> : vector<16x96xf32>
    %27 = tpu.matmul %25, %26, %cst_11 {dimension_numbers = #tpu.dot_dimension_numbers<[1], [0], [0], [1], [0, 0, 1, 1], [], []>} : vector<16x32xbf16>, vector<32x96xbf16>, vector<16x96xf32> -> vector<16x96xf32>
    %c0_12 = arith.constant 0 : index
    %c0_13 = arith.constant 0 : index
    %28 = vector.load %arg5[%c0_12, %c0_13] : memref<1x96xf32, #tpu.memory_space<vmem>>, vector<1x96xf32>
    %29 = vector.broadcast %28 : vector<1x96xf32> to vector<16x96xf32>
    %30 = arith.addf %27, %29 : vector<16x96xf32>
    %31 = vector.extract_strided_slice %30 {offsets = [0, 0], sizes = [16, 64], strides = [1, 1]} : vector<16x96xf32> to vector<16x64xf32>
    %32 = arith.truncf %31 : vector<16x64xf32> to vector<16x64xbf16>
    %c0_14 = arith.constant 0 : index
    %c0_15 = arith.constant 0 : index
    %33 = vector.load %arg6[%c0_14, %c0_15] : memref<16x64xbf16, #tpu.memory_space<vmem>>, vector<16x64xbf16>
    tpu.vector_store %arg6[%c0_14, %c0_15], %32 {strides = array<i32>} : memref<16x64xbf16, #tpu.memory_space<vmem>>, vector<16x64xbf16>,
    %34 = vector.extract_strided_slice %30 {offsets = [0, 64], sizes = [16, 32], strides = [1, 1]} : vector<16x96xf32> to vector<16x32xf32>
    %35 = arith.truncf %34 : vector<16x32xf32> to vector<16x32xbf16>
    %c0_16 = arith.constant 0 : index
    %c0_17 = arith.constant 0 : index
    %36 = vector.load %arg7[%c0_16, %c0_17] : memref<16x32xbf16, #tpu.memory_space<vmem>>, vector<16x32xbf16>
    tpu.vector_store %arg7[%c0_16, %c0_17], %35 {strides = array<i32>} : memref<16x32xbf16, #tpu.memory_space<vmem>>, vector<16x32xbf16>,
    return
  }
  func.func @transform_0(%arg0: i32) -> (i32, i32) {
    %c0_i32 = arith.constant 0 : i32
    %c0_i32_0 = arith.constant 0 : i32
    return %arg0, %c0_i32 : i32, i32
  }
  func.func @transform_1(%arg0: i32) -> (i32, i32) {
    %c0_i32 = arith.constant 0 : i32
    %c0_i32_0 = arith.constant 0 : i32
    %c0_i32_1 = arith.constant 0 : i32
    return %c0_i32, %c0_i32_0 : i32, i32
  }
  func.func @transform_2(%arg0: i32) -> (i32, i32) {
    %c0_i32 = arith.constant 0 : i32
    %c0_i32_0 = arith.constant 0 : i32
    %c0_i32_1 = arith.constant 0 : i32
    return %c0_i32, %c0_i32_0 : i32, i32
  }
  func.func @transform_3(%arg0: i32) -> (i32, i32) {
    %c0_i32 = arith.constant 0 : i32
    %c0_i32_0 = arith.constant 0 : i32
    %c0_i32_1 = arith.constant 0 : i32
    return %c0_i32, %c0_i32_0 : i32, i32
  }
  func.func @transform_4(%arg0: i32) -> (i32, i32) {
    %c0_i32 = arith.constant 0 : i32
    %c0_i32_0 = arith.constant 0 : i32
    %c0_i32_1 = arith.constant 0 : i32
    return %c0_i32, %c0_i32_0 : i32, i32
  }
  func.func @transform_5(%arg0: i32) -> (i32, i32) {
    %c0_i32 = arith.constant 0 : i32
    %c0_i32_0 = arith.constant 0 : i32
    return %arg0, %c0_i32 : i32, i32
  }
  func.func @transform_6(%arg0: i32) -> (i32, i32) {
    %c0_i32 = arith.constant 0 : i32
    %c0_i32_0 = arith.constant 0 : i32
    return %arg0, %c0_i32 : i32, i32
  }
}

module attributes {stable_mosaic.version = 11 : i64} {
  func.func @_attnout_ffn_kernel(%arg0: i32, %arg1: i32, %arg2: memref<16x32xbf16, #tpu.memory_space<vmem>>, %arg3: memref<16x32xf32, #tpu.memory_space<vmem>>, %arg4: memref<32x32xbf16, #tpu.memory_space<vmem>>, %arg5: memref<1x32xf32, #tpu.memory_space<vmem>>, %arg6: memref<1x32xf32, #tpu.memory_space<vmem>>, %arg7: memref<1x32xf32, #tpu.memory_space<vmem>>, %arg8: memref<32x128xbf16, #tpu.memory_space<vmem>>, %arg9: memref<1x128xf32, #tpu.memory_space<vmem>>, %arg10: memref<128x32xbf16, #tpu.memory_space<vmem>>, %arg11: memref<1x32xf32, #tpu.memory_space<vmem>>, %arg12: memref<16x32xf32, #tpu.memory_space<vmem>>, %arg13: memref<16x32xbf16, #tpu.memory_space<vmem>>, %arg14: memref<16x32xf32, #tpu.memory_space<vmem>>) attributes {dimension_semantics = [#tpu.dimension_semantics<parallel>, #tpu.dimension_semantics<arbitrary>], iteration_bounds = array<i64: 1, 1>, scalar_prefetch = 0 : i64, scratch_operands = 2 : i64, tpu.core_type = #tpu.core_type<tc>, window_params = [{transform_indices = @transform_0, window_bounds = array<i64: 16, 32>}, {transform_indices = @transform_1, window_bounds = array<i64: 16, 32>}, {pipeline_mode = #tpu.pipeline_mode<synchronous>, transform_indices = @transform_2, window_bounds = array<i64: 32, 32>}, {pipeline_mode = #tpu.pipeline_mode<synchronous>, transform_indices = @transform_3, window_bounds = array<i64: 1, 32>}, {pipeline_mode = #tpu.pipeline_mode<synchronous>, transform_indices = @transform_4, window_bounds = array<i64: 1, 32>}, {pipeline_mode = #tpu.pipeline_mode<synchronous>, transform_indices = @transform_5, window_bounds = array<i64: 1, 32>}, {transform_indices = @transform_6, window_bounds = array<i64: 32, 128>}, {transform_indices = @transform_7, window_bounds = array<i64: 1, 128>}, {transform_indices = @transform_8, window_bounds = array<i64: 128, 32>}, {pipeline_mode = #tpu.pipeline_mode<synchronous>, transform_indices = @transform_9, window_bounds = array<i64: 1, 32>}, {transform_indices = @transform_10, window_bounds = array<i64: 16, 32>}]} {
    %c0_i32 = arith.constant 0 : i32
    %0 = arith.cmpi eq, %arg1, %c0_i32 : i32
    %1 = arith.extui %0 : i1 to i32
    %c0_i32_0 = arith.constant 0 : i32
    %2 = arith.cmpi ne, %1, %c0_i32_0 : i32
    scf.if %2 {
      %c0_19 = arith.constant 0 : index
      %c0_20 = arith.constant 0 : index
      %31 = vector.load %arg3[%c0_19, %c0_20] : memref<16x32xf32, #tpu.memory_space<vmem>>, vector<16x32xf32>
      %c0_21 = arith.constant 0 : index
      %c0_22 = arith.constant 0 : index
      %32 = vector.load %arg2[%c0_21, %c0_22] : memref<16x32xbf16, #tpu.memory_space<vmem>>, vector<16x32xbf16>
      %c0_23 = arith.constant 0 : index
      %c0_24 = arith.constant 0 : index
      %33 = vector.load %arg4[%c0_23, %c0_24] : memref<32x32xbf16, #tpu.memory_space<vmem>>, vector<32x32xbf16>
      %cst_25 = arith.constant dense<0.000000e+00> : vector<16x32xf32>
      %34 = tpu.matmul %32, %33, %cst_25 {dimension_numbers = #tpu.dot_dimension_numbers<[1], [0], [0], [1], [0, 0, 1, 1], [], []>} : vector<16x32xbf16>, vector<32x32xbf16>, vector<16x32xf32> -> vector<16x32xf32>
      %35 = arith.addf %31, %34 : vector<16x32xf32>
      %c0_26 = arith.constant 0 : index
      %c0_27 = arith.constant 0 : index
      %36 = vector.load %arg5[%c0_26, %c0_27] : memref<1x32xf32, #tpu.memory_space<vmem>>, vector<1x32xf32>
      %37 = vector.broadcast %36 : vector<1x32xf32> to vector<16x32xf32>
      %38 = arith.addf %35, %37 : vector<16x32xf32>
      %c0_28 = arith.constant 0 : index
      %c0_29 = arith.constant 0 : index
      %39 = vector.load %arg6[%c0_28, %c0_29] : memref<1x32xf32, #tpu.memory_space<vmem>>, vector<1x32xf32>
      %c0_30 = arith.constant 0 : index
      %c0_31 = arith.constant 0 : index
      %40 = vector.load %arg7[%c0_30, %c0_31] : memref<1x32xf32, #tpu.memory_space<vmem>>, vector<1x32xf32>
      %cst_32 = arith.constant dense<0.000000e+00> : vector<16xf32>
      %41 = vector.multi_reduction <add>, %38, %cst_32 [1] : vector<16x32xf32> to vector<16xf32>
      %42 = vector.shape_cast %41 : vector<16xf32> to vector<16x1xf32>
      %cst_33 = arith.constant 3.200000e+01 : f32
      %43 = vector.broadcast %cst_33 : f32 to vector<16x1xf32>
      %44 = arith.divf %42, %43 : vector<16x1xf32>
      %45 = vector.broadcast %44 : vector<16x1xf32> to vector<16x32xf32>
      %46 = arith.subf %38, %45 : vector<16x32xf32>
      %47 = arith.mulf %46, %46 : vector<16x32xf32>
      %cst_34 = arith.constant dense<0.000000e+00> : vector<16xf32>
      %48 = vector.multi_reduction <add>, %47, %cst_34 [1] : vector<16x32xf32> to vector<16xf32>
      %49 = vector.shape_cast %48 : vector<16xf32> to vector<16x1xf32>
      %cst_35 = arith.constant 3.200000e+01 : f32
      %50 = vector.broadcast %cst_35 : f32 to vector<16x1xf32>
      %51 = arith.divf %49, %50 : vector<16x1xf32>
      %52 = vector.broadcast %44 : vector<16x1xf32> to vector<16x32xf32>
      %53 = arith.subf %38, %52 : vector<16x32xf32>
      %cst_36 = arith.constant 9.99999997E-7 : f32
      %54 = vector.broadcast %cst_36 : f32 to vector<16x1xf32>
      %55 = arith.addf %51, %54 : vector<16x1xf32>
      %56 = math.rsqrt %55 : vector<16x1xf32>
      %57 = vector.broadcast %56 : vector<16x1xf32> to vector<16x32xf32>
      %58 = arith.mulf %53, %57 : vector<16x32xf32>
      %59 = vector.broadcast %39 : vector<1x32xf32> to vector<16x32xf32>
      %60 = arith.mulf %58, %59 : vector<16x32xf32>
      %61 = vector.broadcast %40 : vector<1x32xf32> to vector<16x32xf32>
      %62 = arith.addf %60, %61 : vector<16x32xf32>
      %63 = arith.truncf %62 : vector<16x32xf32> to vector<16x32xbf16>
      %c0_37 = arith.constant 0 : index
      %c0_38 = arith.constant 0 : index
      %64 = vector.load %arg13[%c0_37, %c0_38] : memref<16x32xbf16, #tpu.memory_space<vmem>>, vector<16x32xbf16>
      tpu.vector_store %arg13[%c0_37, %c0_38], %63 {strides = array<i32>} : memref<16x32xbf16, #tpu.memory_space<vmem>>, vector<16x32xbf16>,
      %c0_39 = arith.constant 0 : index
      %c0_40 = arith.constant 0 : index
      %65 = vector.load %arg11[%c0_39, %c0_40] : memref<1x32xf32, #tpu.memory_space<vmem>>, vector<1x32xf32>
      %66 = vector.broadcast %65 : vector<1x32xf32> to vector<16x32xf32>
      %67 = arith.addf %38, %66 : vector<16x32xf32>
      %c0_41 = arith.constant 0 : index
      %c0_42 = arith.constant 0 : index
      %68 = vector.load %arg14[%c0_41, %c0_42] : memref<16x32xf32, #tpu.memory_space<vmem>>, vector<16x32xf32>
      tpu.vector_store %arg14[%c0_41, %c0_42], %67 {strides = array<i32>} : memref<16x32xf32, #tpu.memory_space<vmem>>, vector<16x32xf32>,
    } else {
    }
    %c0 = arith.constant 0 : index
    %c0_1 = arith.constant 0 : index
    %3 = vector.load %arg13[%c0, %c0_1] : memref<16x32xbf16, #tpu.memory_space<vmem>>, vector<16x32xbf16>
    %c0_2 = arith.constant 0 : index
    %c0_3 = arith.constant 0 : index
    %4 = vector.load %arg8[%c0_2, %c0_3] : memref<32x128xbf16, #tpu.memory_space<vmem>>, vector<32x128xbf16>
    %cst = arith.constant dense<0.000000e+00> : vector<16x128xf32>
    %5 = tpu.matmul %3, %4, %cst {dimension_numbers = #tpu.dot_dimension_numbers<[1], [0], [0], [1], [0, 0, 1, 1], [], []>} : vector<16x32xbf16>, vector<32x128xbf16>, vector<16x128xf32> -> vector<16x128xf32>
    %c0_4 = arith.constant 0 : index
    %c0_5 = arith.constant 0 : index
    %6 = vector.load %arg9[%c0_4, %c0_5] : memref<1x128xf32, #tpu.memory_space<vmem>>, vector<1x128xf32>
    %7 = vector.broadcast %6 : vector<1x128xf32> to vector<16x128xf32>
    %8 = arith.addf %5, %7 : vector<16x128xf32>
    %cst_6 = arith.constant 5.000000e-01 : f32
    %9 = vector.broadcast %cst_6 : f32 to vector<16x128xf32>
    %10 = arith.mulf %9, %8 : vector<16x128xf32>
    %11 = arith.mulf %8, %8 : vector<16x128xf32>
    %12 = arith.mulf %8, %11 : vector<16x128xf32>
    %cst_7 = arith.constant 4.471500e-02 : f32
    %13 = vector.broadcast %cst_7 : f32 to vector<16x128xf32>
    %14 = arith.mulf %13, %12 : vector<16x128xf32>
    %15 = arith.addf %8, %14 : vector<16x128xf32>
    %cst_8 = arith.constant 0.797884583 : f32
    %16 = vector.broadcast %cst_8 : f32 to vector<16x128xf32>
    %17 = arith.mulf %16, %15 : vector<16x128xf32>
    %18 = math.tanh %17 : vector<16x128xf32>
    %cst_9 = arith.constant 1.000000e+00 : f32
    %19 = vector.broadcast %cst_9 : f32 to vector<16x128xf32>
    %20 = arith.addf %19, %18 : vector<16x128xf32>
    %21 = arith.mulf %10, %20 : vector<16x128xf32>
    %c0_10 = arith.constant 0 : index
    %c0_11 = arith.constant 0 : index
    %22 = vector.load %arg14[%c0_10, %c0_11] : memref<16x32xf32, #tpu.memory_space<vmem>>, vector<16x32xf32>
    %23 = arith.truncf %21 : vector<16x128xf32> to vector<16x128xbf16>
    %c0_12 = arith.constant 0 : index
    %c0_13 = arith.constant 0 : index
    %24 = vector.load %arg10[%c0_12, %c0_13] : memref<128x32xbf16, #tpu.memory_space<vmem>>, vector<128x32xbf16>
    %cst_14 = arith.constant dense<0.000000e+00> : vector<16x32xf32>
    %25 = tpu.matmul %23, %24, %cst_14 {dimension_numbers = #tpu.dot_dimension_numbers<[1], [0], [0], [1], [0, 0, 1, 1], [], []>} : vector<16x128xbf16>, vector<128x32xbf16>, vector<16x32xf32> -> vector<16x32xf32>
    %26 = arith.addf %22, %25 : vector<16x32xf32>
    %c0_15 = arith.constant 0 : index
    %c0_16 = arith.constant 0 : index
    %27 = vector.load %arg14[%c0_15, %c0_16] : memref<16x32xf32, #tpu.memory_space<vmem>>, vector<16x32xf32>
    tpu.vector_store %arg14[%c0_15, %c0_16], %26 {strides = array<i32>} : memref<16x32xf32, #tpu.memory_space<vmem>>, vector<16x32xf32>,
    %c0_i32_17 = arith.constant 0 : i32
    %28 = arith.cmpi eq, %arg1, %c0_i32_17 : i32
    %29 = arith.extui %28 : i1 to i32
    %c0_i32_18 = arith.constant 0 : i32
    %30 = arith.cmpi ne, %29, %c0_i32_18 : i32
    scf.if %30 {
      %c0_19 = arith.constant 0 : index
      %c0_20 = arith.constant 0 : index
      %31 = vector.load %arg14[%c0_19, %c0_20] : memref<16x32xf32, #tpu.memory_space<vmem>>, vector<16x32xf32>
      %c0_21 = arith.constant 0 : index
      %c0_22 = arith.constant 0 : index
      %32 = vector.load %arg12[%c0_21, %c0_22] : memref<16x32xf32, #tpu.memory_space<vmem>>, vector<16x32xf32>
      tpu.vector_store %arg12[%c0_21, %c0_22], %31 {strides = array<i32>} : memref<16x32xf32, #tpu.memory_space<vmem>>, vector<16x32xf32>,
    } else {
    }
    return
  }
  func.func @transform_0(%arg0: i32, %arg1: i32) -> (i32, i32) {
    %c0_i32 = arith.constant 0 : i32
    %c0_i32_0 = arith.constant 0 : i32
    return %arg0, %c0_i32 : i32, i32
  }
  func.func @transform_1(%arg0: i32, %arg1: i32) -> (i32, i32) {
    %c0_i32 = arith.constant 0 : i32
    %c0_i32_0 = arith.constant 0 : i32
    return %arg0, %c0_i32 : i32, i32
  }
  func.func @transform_2(%arg0: i32, %arg1: i32) -> (i32, i32) {
    %c0_i32 = arith.constant 0 : i32
    %c0_i32_0 = arith.constant 0 : i32
    %c0_i32_1 = arith.constant 0 : i32
    return %c0_i32, %c0_i32_0 : i32, i32
  }
  func.func @transform_3(%arg0: i32, %arg1: i32) -> (i32, i32) {
    %c0_i32 = arith.constant 0 : i32
    %c0_i32_0 = arith.constant 0 : i32
    %c0_i32_1 = arith.constant 0 : i32
    return %c0_i32, %c0_i32_0 : i32, i32
  }
  func.func @transform_4(%arg0: i32, %arg1: i32) -> (i32, i32) {
    %c0_i32 = arith.constant 0 : i32
    %c0_i32_0 = arith.constant 0 : i32
    %c0_i32_1 = arith.constant 0 : i32
    return %c0_i32, %c0_i32_0 : i32, i32
  }
  func.func @transform_5(%arg0: i32, %arg1: i32) -> (i32, i32) {
    %c0_i32 = arith.constant 0 : i32
    %c0_i32_0 = arith.constant 0 : i32
    %c0_i32_1 = arith.constant 0 : i32
    return %c0_i32, %c0_i32_0 : i32, i32
  }
  func.func @transform_6(%arg0: i32, %arg1: i32) -> (i32, i32) {
    %c0_i32 = arith.constant 0 : i32
    %c0_i32_0 = arith.constant 0 : i32
    return %c0_i32, %arg1 : i32, i32
  }
  func.func @transform_7(%arg0: i32, %arg1: i32) -> (i32, i32) {
    %c0_i32 = arith.constant 0 : i32
    %c0_i32_0 = arith.constant 0 : i32
    return %c0_i32, %arg1 : i32, i32
  }
  func.func @transform_8(%arg0: i32, %arg1: i32) -> (i32, i32) {
    %c0_i32 = arith.constant 0 : i32
    %c0_i32_0 = arith.constant 0 : i32
    return %arg1, %c0_i32 : i32, i32
  }
  func.func @transform_9(%arg0: i32, %arg1: i32) -> (i32, i32) {
    %c0_i32 = arith.constant 0 : i32
    %c0_i32_0 = arith.constant 0 : i32
    %c0_i32_1 = arith.constant 0 : i32
    return %c0_i32, %c0_i32_0 : i32, i32
  }
  func.func @transform_10(%arg0: i32, %arg1: i32) -> (i32, i32) {
    %c0_i32 = arith.constant 0 : i32
    %c0_i32_0 = arith.constant 0 : i32
    return %arg0, %c0_i32 : i32, i32
  }
}

</mosaic_0001>

<bundles_post_ra>
// kernel: tpu_custom_call.1
= control target key start
LH: loop header
LB: loop body
LE: loop exit
PB: predicated region body
PF: predicated region fallthrough
CT: control target
= control target key end

     0   :  { %6 = vsyncpa [#allocation3], 0  ;;  %s448_s0 = inlined_call_operand.hbm [shape: f32[8,128], index: 0, kind: input, shape index: {}]   ;;  %s449_s1 = inlined_call_operand.hbm [shape: f32[16,128], index: 1, kind: output, shape index: {}]  }
   0x1   :  { %7 = vsyncpa [#allocation4], 0 }
   0x2   :  { %9 = vsyncpa [#allocation4 + $0x1], 0  ;;  %s348_s6 = smov 0   ;;  %s350_s7 = smov 0  }
   0x3   :  { %s352_s8 = smov 0   ;;  %s354_s9 = smov 0  }
   0x4 LB: > { %s369_s10 = sadd.s32 4294967295, %s334_s9   ;;  %s184_s11 = sadd.s32 4294967294, %s334_s9   ;;  %s334_s9 = sphi %s354_s9, %s457_s9   ;;  %s330_s8 = sphi %s352_s8, %s456_s8   ;;  %s326_s7 = sphi %s350_s7, %s455_s7   ;;  %s322_s6 = sphi %s348_s6, %s454_s6  }
   0x5   : > { %s373_s12 = sadd.s32 1, %s334_s9   ;;  %s43_s13 = sadd.s32 1, %s330_s8 }
   0x6   : > { %s40_s14 = ssub.s32 %s334_s9, %s373_s12  ;;  %p53_p0 = scmp.ne.s32.totalorder %s330_s8, %s326_s7 }
   0x7   : > { %p41_p1 = scmp.eq.s32.totalorder %s40_s14, 0  ;;  %p54_p2 = scmp.eq.s32.totalorder %s369_s10, 1 }
   0x8   : > { %p59_p3 = scmp.ne.s32.totalorder %s326_s7, %s322_s6  ;;  %p60_p4 = scmp.eq.s32.totalorder %s184_s11, 1 }
   0x9   : > { %s384_s15 = scalar_select %p41_p1, %s330_s8, %s43_s13  }
   0xa   : > { %p386_p5 = por %p54_p2, %p53_p0  ;;  %p390_p6 = por %p60_p4, %p59_p3 }
   0xb   : > { %p185_p7 = scmp.ge.s32.totalorder %s334_s9, 1  ;;  %p67_p8 = scmp.lt.s32.totalorder %s334_s9, 3 }
   0xc   : > { %s451_s17 = scalar_select %p390_p6, 1, 0 }
   0xd   : > { %p208_p9 = scmp.eq.s32.totalorder %s369_s10, 0  ;;  %p397_p10 = pnand %p185_p7, %p67_p8 }
   0xe   : > { %s336_s19 = smov [#allocation2]  }
   0xf   : > { %s80_s20 = sshll.u32 %s336_s19, 4  ;;  %p200_p11 = pneg %p397_p10  ;;  %s81_s20 = int_to_ptr.vmem [resolvable:$true] %s80_s20 }
  0x10   : > { %s255_s21 = scalar_lea.vmem %s81_s20, 128  ;;  %p263_p3 = scmp.lt.s32.totalorder %s81_s20, %s81_s20 }
  0x11   : > { %p201_p12 = pnand %p208_p9, %p200_p11  ;;  %p256_p0 = scmp.ne.s32.totalorder %s81_s20, %s255_s21 }
  0x12   : > { %p264_p4 = scmp.lt.s32.totalorder %s255_s21, %s255_s21 }
  0x13   : > { %p246_p13 = pneg %p201_p12 }
  0x14   : > { %p265_p6 = por %p264_p4, %p263_p3 }
  0x15   : > { %p258_p1 = pnand %p256_p0, %p246_p13 }
  0x17   : > { %p259_p2 = pneg %p258_p1 }
  0x19   : > { %p266_p7 = pnand %p265_p6, %p259_p2 }
  0x1b   : > { %269 = shalt.err (!%p266_p7)
}
  0x1c   : > { %203 = dma.hbm_to_vmem [thread:$0]  (!%p201_p12), %s448_s0, 128, %s81_s20, [#allocation3]  }
  0x1d   : > { %93 = sbr.rel (%p397_p10) target bundleno = 60 (0x3c), region = 24 }
  0x22   : > { %313 = dma.done.wait (%p208_p9), [#allocation3], 128  }
  0x23   : > { %315 = vsyncadd (%p208_p9), [#allocation3], 4294967168  ;;  %s105_s24 = sand.u32 1, %s326_s7   ;;  %s191_s28 = sshll.u32 %s369_s10, 7  ;;  %v108_v0 = vld [vmem:[#allocation2] sm:$0xff] }
  0x24   : > { %s189_s25 = sshll.u32 %s105_s24, 3  ;;  %v109_v1 = vadd.f32 1.0, %v108_v0  ;;  %s123_s2 = scalar_lea.hbm %s449_s1, %s191_s28 }
  0x25   : > { %s107_s26 = scalar_lea.vmem [#allocation5], %s189_s25  ;;  %s112_s3 = scalar_lea.sflag [#allocation4], %s105_s24 }
  0x26   : > { %s125_s27 = sshll.u32 %s107_s26, 4  ;;  %110 = vst [vmem:[%s107_s26] sm:$0xff] %v109_v1  ;;  %s337_s5 = smov [#allocation5]   ;;  %s126_s27 = int_to_ptr.vmem [resolvable:$true] %s125_s27 }
  0x27   : > { %s270_s4 = scalar_lea.vmem %s126_s27, 128  ;;  %s274_s11 = sshll.u32 %s337_s5, 4  ;;  %s275_s11 = int_to_ptr.vmem [resolvable:$false] %s274_s11 }
  0x28   : > { %p271_p6 = scmp.ne.s32.totalorder %s126_s27, %s270_s4  ;;  %s276_s13 = scalar_lea.vmem %s275_s11, 256 }
  0x29   : > { %p277_p10 = scmp.lt.s32.totalorder %s126_s27, %s275_s11  ;;  %p278_p11 = scmp.lt.s32.totalorder %s276_s13, %s270_s4 }
  0x2a   : > { %p272_p8 = pnand %p271_p6, %p386_p5 }
  0x2b   : > { %p279_p12 = por %p278_p11, %p277_p10 }
  0x2c   : > { %p273_p9 = pneg %p272_p8 }
  0x2e   : > { %p280_p13 = pnand %p279_p12, %p273_p9 }
  0x30   : > { %283 = shalt.err (!%p280_p13)
}
  0x31   : > { %s284_s10 = scalar_lea.hbm %s123_s2, 128  ;;  %s288_s19 = scalar_lea.hbm %s449_s1, 256 }
  0x32   : > { %p285_p0 = scmp.ne.s32.totalorder %s123_s2, %s284_s10  ;;  %p289_p3 = scmp.lt.s32.totalorder %s123_s2, %s449_s1 }
  0x33   : > { %p290_p4 = scmp.lt.s32.totalorder %s288_s19, %s284_s10 }
  0x34   : > { %p286_p1 = pnand %p285_p0, %p386_p5 }
  0x35   : > { %p291_p7 = por %p290_p4, %p289_p3 }
  0x36   : > { %p287_p2 = pneg %p286_p1 }
  0x38   : > { %p292_p6 = pnand %p291_p7, %p287_p2 }
  0x3a   : > { %295 = shalt.err (!%p292_p6)
}
  0x3b   : > { %198 = dma.vmem_to_hbm [thread:$0]  (%p386_p5), %s126_s27, 128, %s123_s2, %s112_s3  }
  0x3c PF: > { %p210_p8 = scmp.ge.s32.totalorder %s334_s9, 2  ;;  %s137_s22 = sand.u32 1, %s322_s6  }
  0x3d   : > { %p453_p9 = scmp.ne.s32.totalorder %s451_s17, 0  ;;  %s138_s23 = scalar_lea.sflag [#allocation4], %s137_s22 }
  0x3f   : > { %p205_p10 = pnand %p210_p8, %p453_p9 }
  0x41   : > { %p206_p11 = pneg %p205_p10 }
  0x43   : > { %317 = dma.done.wait (%p206_p11), %s138_s23, 128  }
  0x44   : > { %319 = vsyncadd (%p206_p11), %s138_s23, 4294967168  ;;  %p12_p12 = scmp.ge.s32.totalorder %s373_s12, 4   ;;  %s454_s6 = smov %s326_s7 }
  0x45   : > { %s455_s7 = smov %s330_s8  ;;  %s456_s8 = smov %s384_s15 }
  0x46   : > { %s457_s9 = smov %s373_s12  ;;  %14 = sbr.rel (!%p12_p12) target bundleno = 4 (0x4), region = 61 }
  0x4b   :  { %143 = vsyncpa [#allocation3], 1 }
  0x4c   :  { %145 = vsyncpa [#allocation3 + $0x1], 1 }
  0x4d   :  { %146 = vsyncpa [#allocation4], 1 }
  0x4e   :  { %148 = vsyncpa [#allocation4 + $0x1], 1 }

// kernel: dpbl_layer_forward.8
= control target key start
LH: loop header
LB: loop body
LE: loop exit
PB: predicated region body
PF: predicated region fallthrough
CT: control target
= control target key end

     0   :  { %s1092_s12 = smov 0   ;;  %s1094_s13 = smov 0   ;;  %s1215_s0 = inlined_call_operand.vmem [shape: bf16[2,8,32], index: 0, kind: input, shape index: {}]   ;;  %s1216_s1 = inlined_call_operand.vmem [shape: bf16[2,4,64], index: 1, kind: input, shape index: {}]   ;;  %s1217_s2 = inlined_call_operand.vmem [shape: bf16[2,8,32], index: 2, kind: output, shape index: {0}]   ;;  %s1218_s3 = inlined_call_operand.vmem [shape: f32[2,8,16], index: 3, kind: output, shape index: {1}]  }
   0x1   :  { %s1096_s14 = smov 0  }
   0x2 LB: > { %s26_s15 = sadd.s32 1, %s1051_s13  ;;  %p890_p0 = scmp.ge.s32.totalorder %s1055_s14, 1  ;;  %s1055_s14 = sphi %s1096_s14, %s14_s14   ;;  %s1051_s13 = sphi %s1094_s13, %s1220_s13   ;;  %s1047_s12 = sphi %s1092_s12, %s1219_s12  }
   0x3   : > { %p28_p1 = scmp.ge.s32.totalorder %s26_s15, 2  ;;  %p169_p2 = scmp.lt.s32.totalorder %s1055_s14, 3 }
   0x5   : > { %s1222_s15 = smov (%p28_p1, %s26_s15), 0  ;;  %p170_p3 = pnand %p890_p0, %p169_p2 }
   0x6   : > { %p208_p4 = scmp.lt.s32.totalorder (!%p170_p3), %s1047_s12, 1  ;;  %s1060_s24 = smov (!%p170_p3), 96  }
   0x7   : > { %173 = sbr.rel (%p170_p3) target bundleno = 1377 (0x561), region = 28  ;;  %s1061_s25 = smov (!%p170_p3), 120  }
   0x8   : > { %s1062_s26 = smov (!%p170_p3), 112   ;;  %s1063_s27 = smov (!%p170_p3), 104  }
   0x9   : > { %s1064_s28 = smov (!%p170_p3), 88   ;;  %s1065_s29 = smov (!%p170_p3), 72  }
   0xa   : > { %s1066_s30 = smov (!%p170_p3), 80   ;;  %s1067_s4 = smov (!%p170_p3), 4  }
   0xb   : > { %s1068_s5 = smov (!%p170_p3), 8   ;;  %s1069_s6 = smov (!%p170_p3), 16  }
   0xc   : > { %v1057_v0 = vmov 0.0   ;;  %vm1058_vm0 = vmmov 0   ;;  %s1224_s12 = smov (!%p208_p4, %s1047_s12), 1  ;;  %vm236_vm1 = vcmask 64512   ;;  %vm283_vm2 = vcmask 31744   ;;  %s1070_s7 = smov 12  }
   0xd   : > { %927 = vmatprep.subr.bf16.mxu0 %v1057_v0  ;;  %929 = vmatprep.mubr.msk.bf16.mxu0 %vm1058_vm0, %v1057_v0  ;;  %s892_s16 = sshll.u32 %s1224_s12, 1  ;;  %s891_s17 = sshll.u32 %s1224_s12, 2  ;;  %v300_v9 = vlaneseq  ;;  %v1059_v10 = vmov 1983009808   ;;  %vm309_vm3 = vcmask 1041408   ;;  %vm735_vm4 = vcmask 130048  }
   0xe   : > { %933 = vmatprep.subr.bf16.mxu1 %v1057_v0  ;;  %935 = vmatprep.mubr.msk.bf16.mxu1 %vm1058_vm0, %v1057_v0  ;;  %s218_s20 = scalar_lea.vmem %s1216_s1, %s892_s16  ;;  %s1128_s23 = scalar_lea.vmem %s1215_s0, %s891_s17  ;;  %v298_v11 = vunpack.c.l.s4 %v1059_v10  ;;  %vm737_vm5 = vcmask 195584   ;;  %vm740_vm6 = vcmask 257024   ;;  %vm756_vm7 = vcmask 97280  }
   0xf   : > { %v235_v1 = vld [vmem:[%s218_s20] sm:$0x3]  ;;  %v301_v12 = vshrl.u32 %v300_v9, 7  ;;  %s1071_s8 = smov 24   ;;  %s225_s11 = scalar_lea.vmem %s1217_s2, %s891_s17 }
  0x10   : > { %v241_v2 = vsel %vm236_vm1, %v235_v1, 0  ;;  %v234_v3 = vld [vmem:[%s1128_s23] sm:$0xf]  ;;  %v299_v13 = vunpack.c.0.s8 %v298_v11  ;;  %s894_s16 = sshll.u32 %s1224_s12, 3 }
  0x11   : > { %928 = vmatpush3.bf16.xpose.msra.mxu0 %v241_v2  ;;  %v1137_v16 = vld.sshfl [vmem:[%s218_s20] sm:$0x3 pattern:$0x76325410]  ;;  %s232_s20 = scalar_lea.vmem %s1218_s3, %s894_s16 }
  0x12   : > { %945 = vmatprep.subr.bf16.mxu0 %v1057_v0  ;;  %v302_v14 = vsub.s32 %v299_v13, %v301_v12  ;;  %v1015_v17 = vld [vmem:[%s1128_s23] ss:$0 sps:$4 sm:$0xff]  }
  0x13   : > { %v1016_v18 = vld [vmem:[%s1128_s23] ss:$0 sps:$4 sm:$0xff]  }
  0x14   : > { %v303_v15 = vrot.slane %v235_v1, %v302_v14  ;;  %v1014_v26 = vld [vmem:[%s1128_s23] ss:$0 sps:$4 sm:$0xff]  }
  0x16   : > { %304 = vrot.lane.b32.xlu1 %v303_v15, %s1060_s24 }
  0x18   : > { %930 = vmatmul.mubr.msk.bf16.vlgmr.msra.gmra.mxu0 %vm236_vm1, %v234_v3 }
  0x19   : > { %947 = vmatprep.mubr.msk.bf16.mxu0 %vm1058_vm0, %v1057_v0 }
  0x1a   : > { %368 = vrot.lane.b32.xlu1 %v1137_v16, %s1061_s25 }
  0x1e   : > { %491 = vrot.lane.b32.xlu1 %v1137_v16, %s1062_s26 }
  0x22   : > { %481 = vrot.lane.b32.xlu1 %v1015_v17, %s1062_s26 }
  0x26   : > { %614 = vrot.lane.b32.xlu1 %v1137_v16, %s1063_s27 }
  0x2a   : > { %604 = vrot.lane.b32.xlu1 %v1016_v18, %s1063_s27 }
  0x88   : > { %v305_v24 = vpop.permute.xlu1 %304 }
  0x89   : > { %v311_v25 = vsel %vm309_vm3, %v305_v24, 0 }
  0x8a   : > { %934 = vmatpush3.bf16.msra.mxu1 %v311_v25 }
  0x8b   : > { %939 = vmatprep.subr.bf16.mxu1 %v1057_v0 }
  0x8c   : > { %v369_v29 = vpop.permute.xlu1 %368 }
  0x8d   : > { %v374_v31 = vsel %vm236_vm1, %v369_v29, 0 }
  0x90   : > { %v492_v33 = vpop.permute.xlu1 %491 }
  0x91   : > { %v497_v36 = vsel %vm236_vm1, %v492_v33, 0 }
  0x94   : > { %v482_v35 = vpop.permute.xlu1 %481 }
  0x98   : > { %v615_v37 = vpop.permute.xlu1 %614 }
  0x99   : > { %v620_v38 = vsel %vm236_vm1, %v615_v37, 0 }
  0x9c   : > { %v605_v39 = vpop.permute.xlu1 %604 }
  0xd8   : > { %v277_v4 = vpop.f32.mrf.mxu0 }
  0xd9   : > { %v284_v5 = vsel %vm283_vm2, %v277_v4, -inf }
  0xda   : > { %285 = vmax.xlane.f32.xlu0 %v284_v5  ;;  %v931_v6 = vpop.f32.mrf.mxu0 }
  0xdc   : > { %v280_v7 = vpop.f32.mrf.mxu0 }
  0xde   : > { %v932_v8 = vpop.f32.mrf.mxu0 }
 0x163   : > { %v286_v19 = vpop.xlane.xlu0 %285 }
 0x164   : > { %v287_v20 = vsub.f32 %v277_v4, %v286_v19 }
 0x166   : > { %v288_v21 = vmul.f32 1.442695, %v287_v20 }
 0x168   : > { %1017 = vpow2.f32 %v288_v21 }
 0x175   : > { %v1018_v22 = vpop.eup %1017 }
 0x176   : > { %v290_v23 = vsel %vm283_vm2, %v1018_v22, 0.0 }
 0x177   : > { %291 = vadd.xlane.f32.xlu0 %v290_v23 }
 0x18d   : > { %358 = vrot.lane.b32.xlu0 %v1014_v26, %s1061_s25 }
 0x200   : > { %v292_v27 = vpop.xlane.xlu0 %291 }
 0x201   : > { %1019 = vrcp.f32 %v292_v27 }
 0x204   : > { %v359_v34 = vpop.permute.xlu0 %358 }
 0x20e   : > { %v1020_v28 = vpop.eup %1019 }
 0x20f   : > { %v1148_v30 = vmul.f32 %v1020_v28, %v1018_v22 }
 0x211   : > { %v295_v32 = vpack.c.bf16 %v1148_v30, %v1148_v30 }
 0x213   : > { %936 = vmatmul.mubr.msk.bf16.vlgmr.msra.gmra.mxu1 %vm283_vm2, %v295_v32 }
 0x214   : > { %940 = vmatpush3.bf16.xpose.msra.mxu1 %v374_v31  ;;  %941 = vmatprep.mubr.msk.bf16.mxu1 %vm1058_vm0, %v1057_v0 }
 0x215   : > { %951 = vmatprep.subr.bf16.mxu1 %v1057_v0 }
 0x21b   : > { %942 = vmatmul.mubr.msk.bf16.vlgmr.msra.gmra.mxu1 %vm236_vm1, %v359_v34 }
 0x21c   : > { %952 = vmatpush3.bf16.xpose.msra.mxu1 %v497_v36  ;;  %953 = vmatprep.mubr.msk.bf16.mxu1 %vm1058_vm0, %v1057_v0 }
 0x21d   : > { %963 = vmatprep.subr.bf16.mxu1 %v1057_v0 }
 0x223   : > { %954 = vmatmul.mubr.msk.bf16.vlgmr.msra.gmra.mxu1 %vm236_vm1, %v482_v35 }
 0x224   : > { %964 = vmatpush3.bf16.xpose.msra.mxu1 %v620_v38  ;;  %965 = vmatprep.mubr.msk.bf16.mxu1 %vm1058_vm0, %v1057_v0 }
 0x22b   : > { %966 = vmatmul.mubr.msk.bf16.vlgmr.msra.gmra.mxu1 %vm236_vm1, %v605_v39 }
 0x2d3   : > { %v1167_v40 = vpop.f32.mrf.mxu1 }
 0x2d5   : > { %v937_v41 = vpop.f32.mrf.mxu1 }
 0x2d7   : > { %v350_v42 = vpop.f32.mrf.mxu1 }
 0x2d9   : > { %v938_v43 = vpop.f32.mrf.mxu1 }
 0x2db   : > { %v410_v44 = vpop.f32.mrf.mxu1 }
 0x2dc   : > { %v416_v45 = vsel %vm283_vm2, %v410_v44, -inf }
 0x2dd   : > { %417 = vmax.xlane.f32.xlu1 %v416_v45  ;;  %v943_v46 = vpop.f32.mrf.mxu1 }
 0x2df   : > { %v413_v47 = vpop.f32.mrf.mxu1 }
 0x2e1   : > { %v944_v48 = vpop.f32.mrf.mxu1 }
 0x2e3   : > { %v533_v49 = vpop.f32.mrf.mxu1 }
 0x2e4   : > { %v539_v50 = vsel %vm283_vm2, %v533_v49, -inf }
 0x2e5   : > { %540 = vmax.xlane.f32.xlu0 %v539_v50  ;;  %v955_v51 = vpop.f32.mrf.mxu1 }
 0x2e7   : > { %v536_v52 = vpop.f32.mrf.mxu1 }
 0x2e9   : > { %v956_v53 = vpop.f32.mrf.mxu1 }
 0x2eb   : > { %v656_v54 = vpop.f32.mrf.mxu1 }
 0x2ec   : > { %v662_v55 = vsel %vm283_vm2, %v656_v54, -inf }
 0x2ed   : > { %663 = vmax.xlane.f32.xlu1 %v662_v55  ;;  %v967_v56 = vpop.f32.mrf.mxu1 }
 0x2ef   : > { %v659_v57 = vpop.f32.mrf.mxu1 }
 0x2f1   : > { %v968_v58 = vpop.f32.mrf.mxu1 }
 0x2fe   : > { %428 = vrot.lane.b32.xlu1 %v1137_v16, %s1064_s28 }
 0x366   : > { %v418_v59 = vpop.xlane.xlu1 %417 }
 0x367   : > { %v419_v60 = vsub.f32 %v410_v44, %v418_v59 }
 0x369   : > { %v420_v61 = vmul.f32 1.442695, %v419_v60 }
 0x36b   : > { %1021 = vpow2.f32 %v420_v61 }
 0x36e   : > { %v541_v62 = vpop.xlane.xlu0 %540 }
 0x36f   : > { %v542_v63 = vsub.f32 %v533_v49, %v541_v62 }
 0x371   : > { %v543_v1 = vmul.f32 1.442695, %v542_v63 }
 0x373   : > { %1023 = vpow2.f32 %v543_v1 }
 0x376   : > { %v664_v2 = vpop.xlane.xlu1 %663 }
 0x377   : > { %v665_v3 = vsub.f32 %v656_v54, %v664_v2 }
 0x378   : > { %v1022_v4 = vpop.eup %1021 }
 0x379   : > { %v666_v5 = vmul.f32 1.442695, %v665_v3  ;;  %v422_v6 = vsel %vm283_vm2, %v1022_v4, 0.0 }
 0x37a   : > { %423 = vadd.xlane.f32.xlu0 %v422_v6  ;;  %v429_v7 = vpop.permute.xlu1 %428 }
 0x37b   : > { %1025 = vpow2.f32 %v666_v5  ;;  %v434_v8 = vsel %vm309_vm3, %v429_v7, 0 }
 0x37c   : > { %946 = vmatpush3.bf16.msra.mxu0 %v434_v8 }
 0x37d   : > { %957 = vmatprep.subr.bf16.mxu0 %v1057_v0 }
 0x380   : > { %v1024_v9 = vpop.eup %1023 }
 0x381   : > { %v545_v10 = vsel %vm283_vm2, %v1024_v9, 0.0 }
 0x382   : > { %546 = vadd.xlane.f32.xlu1 %v545_v10 }
 0x388   : > { %v1026_v11 = vpop.eup %1025 }
 0x389   : > { %v668_v12 = vsel %vm283_vm2, %v1026_v11, 0.0 }
 0x38a   : > { %669 = vadd.xlane.f32.xlu0 %v668_v12 }
 0x393   : > { %674 = vrot.lane.b32.xlu1 %v1137_v16, %s1065_s29 }
 0x3a0   : > { %551 = vrot.lane.b32.xlu0 %v1137_v16, %s1066_s30 }
 0x403   : > { %v424_v13 = vpop.xlane.xlu0 %423 }
 0x404   : > { %1027 = vrcp.f32 %v424_v13 }
 0x40b   : > { %v547_v14 = vpop.xlane.xlu1 %546 }
 0x40c   : > { %1029 = vrcp.f32 %v547_v14 }
 0x40f   : > { %v675_v22 = vpop.permute.xlu1 %674 }
 0x410   : > { %v680_v25 = vsel %vm309_vm3, %v675_v22, 0 }
 0x411   : > { %v1028_v15 = vpop.eup %1027 }
 0x412   : > { %v426_v17 = vmul.f32 %v1028_v15, %v1022_v4 }
 0x413   : > { %v670_v18 = vpop.xlane.xlu0 %669 }
 0x414   : > { %1031 = vrcp.f32 %v670_v18  ;;  %v427_v19 = vpack.c.bf16 %v426_v17, %v426_v17  ;;  %743 = vrot.lane.b32.xlu0 %v426_v17, %s1067_s4 }
 0x416   : > { %948 = vmatmul.mubr.msk.bf16.vlgmr.msra.gmra.mxu0 %vm283_vm2, %v427_v19 }
 0x417   : > { %v552_v20 = vpop.permute.xlu0 %551  ;;  %959 = vmatprep.mubr.msk.bf16.mxu0 %vm1058_vm0, %v1057_v0 }
 0x418   : > { %v557_v21 = vsel %vm309_vm3, %v552_v20, 0 }
 0x419   : > { %v1030_v16 = vpop.eup %1029  ;;  %958 = vmatpush3.bf16.msra.mxu0 %v557_v21 }
 0x41a   : > { %v549_v23 = vmul.f32 %v1030_v16, %v1024_v9  ;;  %969 = vmatprep.subr.bf16.mxu0 %v1057_v0 }
 0x41c   : > { %v550_v24 = vpack.c.bf16 %v549_v23, %v549_v23 }
 0x41e   : > { %960 = vmatmul.mubr.msk.bf16.vlgmr.msra.gmra.mxu0 %vm283_vm2, %v550_v24 }
 0x41f   : > { %970 = vmatpush3.bf16.msra.mxu0 %v680_v25  ;;  %971 = vmatprep.mubr.msk.bf16.mxu0 %vm1058_vm0, %v1057_v0 }
 0x421   : > { %v1032_v26 = vpop.eup %1031 }
 0x422   : > { %v672_v27 = vmul.f32 %v1032_v26, %v1026_v11 }
 0x424   : > { %v673_v28 = vpack.c.bf16 %v672_v27, %v672_v27 }
 0x426   : > { %972 = vmatmul.mubr.msk.bf16.vlgmr.msra.gmra.mxu0 %vm283_vm2, %v673_v28 }
 0x486   : > { %v744_v42 = vpop.permute.xlu0 %743 }
 0x487   : > { %v754_v50 = vsel %vm283_vm2, %v1148_v30, %v744_v42 }
 0x4d6   : > { %v470_v29 = vpop.f32.mrf.mxu0 }
 0x4d7   : > { %723 = vrot.lane.b32.xlu1 %v470_v29, %s1068_s5 }
 0x4d8   : > { %v949_v31 = vpop.f32.mrf.mxu0 }
 0x4da   : > { %v473_v32 = vpop.f32.mrf.mxu0 }
 0x4dc   : > { %v950_v33 = vpop.f32.mrf.mxu0 }
 0x4de   : > { %v593_v34 = vpop.f32.mrf.mxu0 }
 0x4df   : > { %727 = vrot.lane.b32.xlu0 %v593_v34, %s1069_s6 }
 0x4e0   : > { %v961_v35 = vpop.f32.mrf.mxu0 }
 0x4e2   : > { %v596_v36 = vpop.f32.mrf.mxu0 }
 0x4e3   : > { %751 = vrot.lane.b32.xlu0 %v672_v27, %s1070_s7 }
 0x4e4   : > { %v962_v37 = vpop.f32.mrf.mxu0 }
 0x4e6   : > { %v716_v0 = vpop.f32.mrf.mxu0 }
 0x4e7   : > { %731 = vrot.lane.b32.xlu1 %v716_v0, %s1071_s8 }
 0x4e8   : > { %v973_v38 = vpop.f32.mrf.mxu0 }
 0x4ea   : > { %v719_v39 = vpop.f32.mrf.mxu0 }
 0x4eb   : > { %747 = vrot.lane.b32.xlu1 %v549_v23, %s1068_s5 }
 0x4ec   : > { %v974_v41 = vpop.f32.mrf.mxu0 }
 0x549   : > { %v724_v43 = vpop.permute.xlu1 %723 }
 0x54a   : > { %v734_v45 = vsel %vm236_vm1, %v1167_v40, %v724_v43 }
 0x551   : > { %v728_v44 = vpop.permute.xlu0 %727 }
 0x552   : > { %v736_v46 = vsel %vm735_vm4, %v734_v45, %v728_v44 }
 0x555   : > { %v752_v51 = vpop.permute.xlu0 %751 }
 0x559   : > { %v732_v47 = vpop.permute.xlu1 %731 }
 0x55a   : > { %v738_v48 = vsel %vm737_vm5, %v736_v46, %v732_v47 }
 0x55b   : > { %v739_v49 = vpack.c.bf16 %v738_v48, %v738_v48 }
 0x55d   : > { %741 = vst.msk [vmem:[%s225_s11] sm:$0xf] %vm740_vm6, %v739_v49  ;;  %v748_v40 = vpop.permute.xlu1 %747 }
 0x55e   : > { %v755_v52 = vsel %vm236_vm1, %v754_v50, %v748_v40 }
 0x55f   : > { %v757_v53 = vsel %vm756_vm7, %v755_v52, %v752_v51 }
 0x560   : > { %758 = vst.msk [vmem:[%s232_s20] sm:$0xff] %vm735_vm4, %v757_v53 }
 0x561 PF: > { %s14_s14 = sadd.s32 1, %s1055_s14   ;;  %s1219_s12 = smov %s1051_s13 }
 0x562   : > { %p11_p5 = scmp.ge.s32.totalorder %s14_s14, 4   ;;  %s1220_s13 = smov %s1222_s15 }
 0x564   :  { %13 = sbr.rel (!%p11_p5) target bundleno = 2 (0x2), region = 73 }

// kernel: dpbl_layer_forward.6
= control target key start
LH: loop header
LB: loop body
LE: loop exit
PB: predicated region body
PF: predicated region fallthrough
CT: control target
= control target key end

     0   :  { %10 = vsyncpa [#allocation3], 0  ;;  %s1344_s0 = inlined_call_operand.vmem [shape: bf16[4,32], index: 0, kind: input, shape index: {}]   ;;  %s1345_s1 = inlined_call_operand.vmem [shape: bf16[2,8,64], index: 1, kind: input, shape index: {}]   ;;  %s1346_s2 = inlined_call_operand.vmem [shape: s32[2,1,8], index: 2, kind: input, shape index: {}]   ;;  %s1347_s3 = inlined_call_operand.vmem [shape: bf16[2,4,32], index: 3, kind: output, shape index: {0}]   ;;  %s1348_s4 = inlined_call_operand.hbm [shape: f32[2,4,4,8], index: 4, kind: output, shape index: {1}]  }
   0x1   :  { %12 = vsyncpa [#allocation3 + $0x1], 0  ;;  %s1129_s15 = smov 0   ;;  %s1131_s16 = smov 0  }
   0x2   :  { %s1133_s17 = smov 0   ;;  %s1135_s18 = smov 0  }
   0x3 LB: > { %s1150_s19 = sadd.s32 4294967295, %s1086_s18   ;;  %s857_s20 = sadd.s32 4294967294, %s1086_s18   ;;  %s1086_s18 = sphi %s1135_s18, %s1354_s18   ;;  %s1082_s17 = sphi %s1133_s17, %s1353_s17   ;;  %s1078_s16 = sphi %s1131_s16, %s1352_s16   ;;  %s1074_s15 = sphi %s1129_s15, %s1351_s15  }
   0x4   : > { %s1154_s21 = sadd.s32 1, %s1086_s18   ;;  %s124_s22 = sadd.s32 1, %s1082_s17 }
   0x5   : > { %s121_s23 = ssub.s32 %s1086_s18, %s1154_s21  ;;  %p134_p0 = scmp.ne.s32.totalorder %s1082_s17, %s1078_s16 }
   0x6   : > { %p122_p1 = scmp.eq.s32.totalorder %s121_s23, 0  ;;  %p135_p2 = scmp.eq.s32.totalorder %s1150_s19, 1 }
   0x7   : > { %p140_p3 = scmp.ne.s32.totalorder %s1078_s16, %s1074_s15  ;;  %p141_p4 = scmp.eq.s32.totalorder %s857_s20, 1 }
   0x8   : > { %s1165_s24 = scalar_select %p122_p1, %s1082_s17, %s124_s22  }
   0x9   : > { %p1167_p5 = por %p135_p2, %p134_p0  ;;  %p1171_p6 = por %p141_p4, %p140_p3 }
   0xa   : > { %p860_p7 = scmp.ge.s32.totalorder %s1086_s18, 1  ;;  %p175_p8 = scmp.lt.s32.totalorder %s1086_s18, 3 }
   0xc   : > { %p176_p9 = pnand %p860_p7, %p175_p8 }
   0xd   : > { %p207_p10 = scmp.lt.s32.totalorder (!%p176_p9), %s1150_s19, 1  ;;  %s1091_s11 = smov (!%p176_p9), 96  }
   0xe   : > { %179 = sbr.rel (%p176_p9) target bundleno = 1394 (0x572), region = 32  ;;  %s1092_s12 = smov (!%p176_p9), 120  }
   0xf   : > { %s1093_s13 = smov (!%p176_p9), 112   ;;  %s1094_s22 = smov (!%p176_p9), 104  }
  0x10   : > { %s204_s23 = sand.u32 (!%p176_p9), 1, %s1078_s16   ;;  %s1095_s30 = smov (!%p176_p9), 88  }
  0x11   : > { %s1097_s6 = smov (!%p176_p9), 80   ;;  %s1098_s7 = smov (!%p176_p9), 8  }
  0x12   : > { %s887_s8 = sshll.u32 (!%p176_p9), %s1150_s19, 8  ;;  %s1298_s14 = scalar_lea.sflag (!%p176_p9), [#allocation3], %s204_s23 }
  0x13   : > { %v1088_v0 = vmov 0.0   ;;  %vm1089_vm0 = vmmov 0   ;;  %s1182_s27 = scalar_select %p207_p10, %s1150_s19, 1  ;;  %vm223_vm1 = vcmask 64512   ;;  %v221_v3 = vld [vmem:[%s1344_s0] sm:$0x3]  ;;  %v271_v4 = vlaneseq }
  0x14   : > { %904 = vmatprep.subr.bf16.mxu0 %v1088_v0  ;;  %906 = vmatprep.mubr.msk.bf16.mxu0 %vm1089_vm0, %v1088_v0  ;;  %v1090_v8 = vmov 0   ;;  %vm277_vm4 = vcmask 60416   ;;  %v867_v20 = vld.sshfl [vmem:[%s1344_s0] sm:$0x3 pattern:$0x76325410] }
  0x15   : > { %910 = vmatprep.subr.bf16.mxu1 %v1088_v0  ;;  %912 = vmatprep.mubr.msk.bf16.mxu1 %vm1089_vm0, %v1088_v0  ;;  %s862_s28 = sshll.u32 %s1182_s27, 2  ;;  %s213_s10 = scalar_lea.vmem %s1346_s2, %s1182_s27  ;;  %v272_v6 = vshrl.u32 %v271_v4, 7  ;;  %vm299_vm5 = vcmask 1043456  }
  0x16   : > { %s1191_s5 = scalar_lea.vmem %s1345_s1, %s862_s28  ;;  %v219_v5 = vld [vmem:[%s213_s10] sm:$0x1]  ;;  %s861_s28 = sshll.u32 %s204_s23, 4 }
  0x17   : > { %v222_v1 = vld [vmem:[%s1191_s5] sm:$0xf]  ;;  %vm220_vm2 = vcmp.gt.s32.totalorder %v219_v5, 0  ;;  %v273_v7 = vsub.s32 0, %v272_v6  ;;  %s1234_s29 = scalar_lea.vmem [#allocation2], %s861_s28  ;;  %s1100_s20 = smov [#allocation2]  }
  0x18   : > { %v228_v2 = vsel %vm223_vm1, %v222_v1, 0  ;;  %v270_v9 = vsel %vm220_vm2, 1, %v1090_v8  ;;  %v865_v17 = vcombine.low %v222_v1, %v222_v1  ;;  %v1213_v18 = vld [vmem:[%s1191_s5] ss:$0 sps:$4 sm:$0xff]   ;;  %s762_s9 = sshll.u32 %s1234_s29, 4  ;;  %s1294_s9 = int_to_ptr.vmem [resolvable:$true] %s762_s9 }
  0x19   : > { %905 = vmatpush3.bf16.xpose.msra.mxu0 %v228_v2  ;;  %v1206_v10 = vrot.slane %v270_v9, %v273_v7  ;;  %v1217_v19 = vld [vmem:[%s1191_s5] ss:$0 sps:$4 sm:$0xff]   ;;  %s1026_s19 = scalar_lea.vmem %s1294_s9, 256 }
  0x1a   : > { %922 = vmatprep.subr.bf16.mxu0 %v1088_v0  ;;  %294 = vrot.lane.b32.xlu1 %v865_v17, %s1091_s11  ;;  %v1224_v21 = vld [vmem:[%s1191_s5] ss:$0 sps:$4 sm:$0xff]   ;;  %s1096_s5 = smov 72   ;;  %p1027_p11 = scmp.ne.s32.totalorder %s1294_s9, %s1026_s19 }
  0x1b   : > { %vm275_vm3 = vcmp.eq.s32.totalorder %v1206_v10, 1 }
  0x1c   : > { %p1028_p12 = pnand %p1027_p11, %p1167_p5 }
  0x1e   : > { %358 = vrot.lane.b32.xlu1 %v1213_v18, %s1092_s12  ;;  %p1029_p13 = pneg %p1028_p12 }
  0x20   : > { %907 = vmatmul.mubr.msk.bf16.vlgmr.msra.gmra.mxu0 %vm223_vm1, %v221_v3 }
  0x21   : > { %924 = vmatprep.mubr.msk.bf16.mxu0 %vm1089_vm0, %v1088_v0 }
  0x22   : > { %484 = vrot.lane.b32.xlu1 %v1217_v19, %s1093_s13 }
  0x26   : > { %479 = vrot.lane.b32.xlu1 %v867_v20, %s1093_s13  ;;  %s1099_s13 = smov 16  }
  0x2a   : > { %610 = vrot.lane.b32.xlu1 %v1224_v21, %s1094_s22 }
  0x2e   : > { %605 = vrot.lane.b32.xlu1 %v867_v20, %s1094_s22  ;;  %s1030_s22 = sshll.u32 %s1100_s20, 4  ;;  %s1031_s22 = int_to_ptr.vmem [resolvable:$false] %s1030_s22 }
  0x2f   : > { %s1032_s28 = scalar_lea.vmem %s1031_s22, 512  ;;  %p1033_p0 = scmp.lt.s32.totalorder %s1294_s9, %s1031_s22 }
  0x30   : > { %p1034_p1 = scmp.lt.s32.totalorder %s1032_s28, %s1026_s19 }
  0x32   : > { %p1035_p2 = por %p1034_p1, %p1033_p0 }
  0x34   : > { %p1036_p3 = pnand %p1035_p2, %p1029_p13 }
  0x8c   : > { %v295_v27 = vpop.permute.xlu1 %294 }
  0x8d   : > { %v301_v28 = vsel %vm299_vm5, %v295_v27, 0 }
  0x8e   : > { %911 = vmatpush3.bf16.msra.mxu1 %v301_v28 }
  0x8f   : > { %916 = vmatprep.subr.bf16.mxu1 %v1088_v0 }
  0x90   : > { %v359_v31 = vpop.permute.xlu1 %358 }
  0x91   : > { %v364_v33 = vsel %vm223_vm1, %v359_v31, 0 }
  0x94   : > { %v485_v35 = vpop.permute.xlu1 %484 }
  0x95   : > { %v490_v38 = vsel %vm223_vm1, %v485_v35, 0 }
  0x98   : > { %v480_v37 = vpop.permute.xlu1 %479 }
  0x9c   : > { %v611_v39 = vpop.permute.xlu1 %610 }
  0x9d   : > { %v616_v40 = vsel %vm223_vm1, %v611_v39, 0 }
  0xa0   : > { %v606_v41 = vpop.permute.xlu1 %605 }
  0xe0   : > { %v264_v11 = vpop.f32.mrf.mxu0 }
  0xe1   : > { %v276_v12 = vsel %vm275_vm3, %v264_v11, -1e+09 }
  0xe2   : > { %v908_v13 = vpop.f32.mrf.mxu0  ;;  %v278_v14 = vsel %vm277_vm4, %v276_v12, -inf }
  0xe3   : > { %279 = vmax.xlane.f32.xlu0 %v278_v14 }
  0xe4   : > { %v267_v15 = vpop.f32.mrf.mxu0 }
  0xe6   : > { %v909_v16 = vpop.f32.mrf.mxu0 }
 0x16c   : > { %v280_v22 = vpop.xlane.xlu0 %279 }
 0x16d   : > { %v281_v23 = vsub.f32 %v276_v12, %v280_v22 }
 0x16f   : > { %v282_v24 = vmul.f32 1.442695, %v281_v23 }
 0x171   : > { %1010 = vpow2.f32 %v282_v24 }
 0x17e   : > { %v1011_v25 = vpop.eup %1010 }
 0x17f   : > { %v284_v26 = vsel %vm277_vm4, %v1011_v25, 0.0 }
 0x180   : > { %285 = vadd.xlane.f32.xlu0 %v284_v26 }
 0x196   : > { %353 = vrot.lane.b32.xlu0 %v867_v20, %s1092_s12  ;;  %s1292_s12 = scalar_lea.hbm %s1348_s4, %s887_s8 }
 0x209   : > { %v286_v29 = vpop.xlane.xlu0 %285 }
 0x20a   : > { %1012 = vrcp.f32 %v286_v29 }
 0x20d   : > { %v354_v36 = vpop.permute.xlu0 %353 }
 0x217   : > { %v1013_v30 = vpop.eup %1012 }
 0x218   : > { %v288_v32 = vmul.f32 %v1013_v30, %v1011_v25 }
 0x21a   : > { %289 = vst.msk [vmem:[%s1234_s29] sm:$0xf] %vm277_vm4, %v288_v32  ;;  %v290_v34 = vpack.c.bf16 %v288_v32, %v288_v32 }
 0x21c   : > { %913 = vmatmul.mubr.msk.bf16.vlgmr.msra.gmra.mxu1 %vm223_vm1, %v290_v34 }
 0x21d   : > { %917 = vmatpush3.bf16.xpose.msra.mxu1 %v364_v33  ;;  %918 = vmatprep.mubr.msk.bf16.mxu1 %vm1089_vm0, %v1088_v0 }
 0x21e   : > { %928 = vmatprep.subr.bf16.mxu1 %v1088_v0 }
 0x224   : > { %919 = vmatmul.mubr.msk.bf16.vlgmr.msra.gmra.mxu1 %vm223_vm1, %v354_v36 }
 0x225   : > { %929 = vmatpush3.bf16.xpose.msra.mxu1 %v490_v38  ;;  %930 = vmatprep.mubr.msk.bf16.mxu1 %vm1089_vm0, %v1088_v0 }
 0x226   : > { %940 = vmatprep.subr.bf16.mxu1 %v1088_v0 }
 0x22c   : > { %931 = vmatmul.mubr.msk.bf16.vlgmr.msra.gmra.mxu1 %vm223_vm1, %v480_v37 }
 0x22d   : > { %941 = vmatpush3.bf16.xpose.msra.mxu1 %v616_v40  ;;  %942 = vmatprep.mubr.msk.bf16.mxu1 %vm1089_vm0, %v1088_v0 }
 0x234   : > { %943 = vmatmul.mubr.msk.bf16.vlgmr.msra.gmra.mxu1 %vm223_vm1, %v606_v41 }
 0x2dc   : > { %v1252_v42 = vpop.f32.mrf.mxu1 }
 0x2de   : > { %v914_v43 = vpop.f32.mrf.mxu1 }
 0x2e0   : > { %v340_v44 = vpop.f32.mrf.mxu1 }
 0x2e2   : > { %v915_v45 = vpop.f32.mrf.mxu1 }
 0x2e4   : > { %v400_v46 = vpop.f32.mrf.mxu1 }
 0x2e5   : > { %v406_v47 = vsel %vm275_vm3, %v400_v46, -1e+09 }
 0x2e6   : > { %v920_v48 = vpop.f32.mrf.mxu1  ;;  %v407_v49 = vsel %vm277_vm4, %v406_v47, -inf }
 0x2e7   : > { %408 = vmax.xlane.f32.xlu1 %v407_v49 }
 0x2e8   : > { %v403_v50 = vpop.f32.mrf.mxu1 }
 0x2ea   : > { %v921_v51 = vpop.f32.mrf.mxu1 }
 0x2ec   : > { %v526_v52 = vpop.f32.mrf.mxu1 }
 0x2ed   : > { %v532_v53 = vsel %vm275_vm3, %v526_v52, -1e+09 }
 0x2ee   : > { %v932_v54 = vpop.f32.mrf.mxu1  ;;  %v533_v55 = vsel %vm277_vm4, %v532_v53, -inf }
 0x2ef   : > { %534 = vmax.xlane.f32.xlu0 %v533_v55 }
 0x2f0   : > { %v529_v56 = vpop.f32.mrf.mxu1 }
 0x2f2   : > { %v933_v57 = vpop.f32.mrf.mxu1 }
 0x2f4   : > { %v652_v58 = vpop.f32.mrf.mxu1 }
 0x2f5   : > { %v658_v59 = vsel %vm275_vm3, %v652_v58, -1e+09 }
 0x2f6   : > { %v944_v60 = vpop.f32.mrf.mxu1  ;;  %v659_v61 = vsel %vm277_vm4, %v658_v59, -inf }
 0x2f7   : > { %660 = vmax.xlane.f32.xlu1 %v659_v61 }
 0x2f8   : > { %v655_v62 = vpop.f32.mrf.mxu1 }
 0x2fa   : > { %v945_v63 = vpop.f32.mrf.mxu1 }
 0x308   : > { %421 = vrot.lane.b32.xlu1 %v1213_v18, %s1095_s30 }
 0x370   : > { %v409_v1 = vpop.xlane.xlu1 %408 }
 0x371   : > { %v410_v2 = vsub.f32 %v406_v47, %v409_v1 }
 0x373   : > { %v411_v3 = vmul.f32 1.442695, %v410_v2 }
 0x375   : > { %1014 = vpow2.f32 %v411_v3 }
 0x378   : > { %v535_v4 = vpop.xlane.xlu0 %534 }
 0x379   : > { %v536_v5 = vsub.f32 %v532_v53, %v535_v4 }
 0x37b   : > { %v537_v6 = vmul.f32 1.442695, %v536_v5 }
 0x37d   : > { %1016 = vpow2.f32 %v537_v6 }
 0x380   : > { %v661_v7 = vpop.xlane.xlu1 %660 }
 0x381   : > { %v662_v8 = vsub.f32 %v658_v59, %v661_v7 }
 0x382   : > { %v1015_v9 = vpop.eup %1014 }
 0x383   : > { %v663_v10 = vmul.f32 1.442695, %v662_v8  ;;  %v413_v11 = vsel %vm277_vm4, %v1015_v9, 0.0 }
 0x384   : > { %414 = vadd.xlane.f32.xlu0 %v413_v11  ;;  %v422_v12 = vpop.permute.xlu1 %421 }
 0x385   : > { %1018 = vpow2.f32 %v663_v10  ;;  %v427_v13 = vsel %vm299_vm5, %v422_v12, 0 }
 0x386   : > { %923 = vmatpush3.bf16.msra.mxu0 %v427_v13 }
 0x387   : > { %934 = vmatprep.subr.bf16.mxu0 %v1088_v0 }
 0x38a   : > { %v1017_v14 = vpop.eup %1016 }
 0x38b   : > { %v539_v15 = vsel %vm277_vm4, %v1017_v14, 0.0 }
 0x38c   : > { %540 = vadd.xlane.f32.xlu1 %v539_v15 }
 0x392   : > { %v1019_v16 = vpop.eup %1018 }
 0x393   : > { %v665_v17 = vsel %vm277_vm4, %v1019_v16, 0.0 }
 0x394   : > { %666 = vadd.xlane.f32.xlu0 %v665_v17 }
 0x39d   : > { %673 = vrot.lane.b32.xlu1 %v1224_v21, %s1096_s5 }
 0x3aa   : > { %547 = vrot.lane.b32.xlu0 %v1217_v19, %s1097_s6 }
 0x40d   : > { %v415_v18 = vpop.xlane.xlu0 %414 }
 0x40e   : > { %1020 = vrcp.f32 %v415_v18 }
 0x415   : > { %v541_v20 = vpop.xlane.xlu1 %540 }
 0x416   : > { %1022 = vrcp.f32 %v541_v20 }
 0x419   : > { %v674_v27 = vpop.permute.xlu1 %673 }
 0x41a   : > { %v679_v30 = vsel %vm299_vm5, %v674_v27, 0 }
 0x41b   : > { %v1021_v22 = vpop.eup %1020 }
 0x41c   : > { %v417_v23 = vmul.f32 %v1021_v22, %v1015_v9 }
 0x41d   : > { %v667_v24 = vpop.xlane.xlu0 %666 }
 0x41e   : > { %1024 = vrcp.f32 %v667_v24  ;;  %870 = vst.msk [vmem:[%s1234_s29 + $0x4] sm:$0xf] %vm277_vm4, %v417_v23  ;;  %v420_v25 = vpack.c.bf16 %v417_v23, %v417_v23 }
 0x420   : > { %925 = vmatmul.mubr.msk.bf16.vlgmr.msra.gmra.mxu0 %vm223_vm1, %v420_v25 }
 0x421   : > { %v548_v26 = vpop.permute.xlu0 %547  ;;  %936 = vmatprep.mubr.msk.bf16.mxu0 %vm1089_vm0, %v1088_v0 }
 0x422   : > { %v553_v19 = vsel %vm299_vm5, %v548_v26, 0 }
 0x423   : > { %v1023_v21 = vpop.eup %1022  ;;  %935 = vmatpush3.bf16.msra.mxu0 %v553_v19 }
 0x424   : > { %v543_v28 = vmul.f32 %v1023_v21, %v1017_v14  ;;  %946 = vmatprep.subr.bf16.mxu0 %v1088_v0 }
 0x426   : > { %875 = vst.msk [vmem:[%s1234_s29 + $0x8] sm:$0xf] %vm277_vm4, %v543_v28  ;;  %v546_v29 = vpack.c.bf16 %v543_v28, %v543_v28 }
 0x428   : > { %937 = vmatmul.mubr.msk.bf16.vlgmr.msra.gmra.mxu0 %vm223_vm1, %v546_v29 }
 0x429   : > { %947 = vmatpush3.bf16.msra.mxu0 %v679_v30  ;;  %948 = vmatprep.mubr.msk.bf16.mxu0 %vm1089_vm0, %v1088_v0 }
 0x42b   : > { %v1025_v31 = vpop.eup %1024 }
 0x42c   : > { %v669_v32 = vmul.f32 %v1025_v31, %v1019_v16 }
 0x42e   : > { %880 = vst.msk [vmem:[%s1234_s29 + $0xc] sm:$0xf] %vm277_vm4, %v669_v32  ;;  %v672_v33 = vpack.c.bf16 %v669_v32, %v669_v32 }
 0x430   : > { %949 = vmatmul.mubr.msk.bf16.vlgmr.msra.gmra.mxu0 %vm223_vm1, %v672_v33 }
 0x4e0   : > { %v463_v34 = vpop.f32.mrf.mxu0 }
 0x4e1   : > { %722 = vrot.lane.b32.xlu1 %v463_v34, %s1098_s7 }
 0x4e2   : > { %v926_v35 = vpop.f32.mrf.mxu0 }
 0x4e4   : > { %v466_v36 = vpop.f32.mrf.mxu0 }
 0x4e6   : > { %v927_v37 = vpop.f32.mrf.mxu0 }
 0x4e8   : > { %v589_v0 = vpop.f32.mrf.mxu0 }
 0x4e9   : > { %726 = vrot.lane.b32.xlu0 %v589_v0, %s1099_s13 }
 0x4ea   : > { %v938_v38 = vpop.f32.mrf.mxu0 }
 0x4eb   : > { %1039 = shalt.err (!%p1036_p3)
}
 0x4ec   : > { %s1040_s23 = scalar_lea.hbm %s1292_s12, 256  ;;  %s1044_s5 = scalar_lea.hbm %s1348_s4, 512 }
 0x4ed   : > { %p1041_p4 = scmp.ne.s32.totalorder %s1292_s12, %s1040_s23  ;;  %p1045_p9 = scmp.lt.s32.totalorder %s1292_s12, %s1348_s4 }
 0x4ee   : > { %p1046_p10 = scmp.lt.s32.totalorder %s1044_s5, %s1040_s23 }
 0x4ef   : > { %p1042_p7 = pnand %p1041_p4, %p1167_p5 }
 0x4f0   : > { %p1047_p11 = por %p1046_p10, %p1045_p9 }
 0x4f1   : > { %p1043_p8 = pneg %p1042_p7 }
 0x4f3   : > { %p1048_p12 = pnand %p1047_p11, %p1043_p8 }
 0x4f5   : > { %1051 = shalt.err (!%p1048_p12)
}
 0x4f6   : > { %s1101_s8 = smov 64   ;;  %s1102_s10 = smov 4   ;;  %v592_v39 = vpop.f32.mrf.mxu0  ;;  %vm734_vm6 = vcmask 130048   ;;  %vm736_vm7 = vcmask 195584   ;;  %vm739_vm8 = vcmask 254976  }
 0x4f7   : > { %952 = dma.vmem_to_hbm [thread:$0]  (%p1167_p5), %s1294_s9, 256, %s1292_s12, %s1298_s14, %s1101_s8, %s1101_s8, %s1102_s10  }
 0x4f8   : > { %v939_v40 = vpop.f32.mrf.mxu0  ;;  %s1103_s11 = smov 24   ;;  %s863_s13 = sshll.u32 %s1182_s27, 1 }
 0x4f9   : > { %s217_s12 = scalar_lea.vmem %s1347_s3, %s863_s13 }
 0x4fa   : > { %v715_v41 = vpop.f32.mrf.mxu0 }
 0x4fb   : > { %730 = vrot.lane.b32.xlu1 %v715_v41, %s1103_s11 }
 0x4fc   : > { %v950_v43 = vpop.f32.mrf.mxu0 }
 0x4fe   : > { %v718_v44 = vpop.f32.mrf.mxu0 }
 0x500   : > { %v951_v45 = vpop.f32.mrf.mxu0 }
 0x553   : > { %v723_v46 = vpop.permute.xlu1 %722 }
 0x554   : > { %v733_v48 = vsel %vm223_vm1, %v1252_v42, %v723_v46 }
 0x55b   : > { %v727_v47 = vpop.permute.xlu0 %726 }
 0x55c   : > { %v735_v49 = vsel %vm734_vm6, %v733_v48, %v727_v47 }
 0x56d   : > { %v731_v50 = vpop.permute.xlu1 %730 }
 0x56e   : > { %v737_v51 = vsel %vm736_vm7, %v735_v49, %v731_v50 }
 0x56f   : > { %v738_v52 = vpack.c.bf16 %v737_v51, %v737_v51 }
 0x571   : > { %740 = vst.msk [vmem:[%s217_s12] sm:$0x3] %vm739_vm8, %v738_v52 }
 0x572 PF: > { %p958_p5 = scmp.ge.s32.totalorder %s1086_s18, 2  ;;  %s784_s27 = sand.u32 1, %s1074_s15  }
 0x573   : > { %s785_s14 = scalar_lea.sflag [#allocation3], %s784_s27 }
 0x574   : > { %p955_p13 = pnand %p958_p5, %p1171_p6 }
 0x576   : > { %p956_p0 = pneg %p955_p13 }
 0x578   : > { %1069 = dma.done.wait (%p956_p0), %s785_s14, 256  }
 0x579   : > { %1071 = vsyncadd (%p956_p0), %s785_s14, 4294967040  ;;  %p15_p1 = scmp.ge.s32.totalorder %s1154_s21, 4   ;;  %s1351_s15 = smov %s1078_s16 }
 0x57a   : > { %s1352_s16 = smov %s1082_s17  ;;  %s1353_s17 = smov %s1165_s24 }
 0x57b   : > { %s1354_s18 = smov %s1154_s21  ;;  %17 = sbr.rel (!%p15_p1) target bundleno = 3 (0x3), region = 85 }
 0x580   :  { %790 = vsyncpa [#allocation3], 1 }
 0x581   :  { %792 = vsyncpa [#allocation3 + $0x1], 1 }

// kernel: dpbl_layer_forward.7
= control target key start
LH: loop header
LB: loop body
LE: loop exit
PB: predicated region body
PF: predicated region fallthrough
CT: control target
= control target key end

     0   :  { %v240_v1 = vmov 0.0   ;;  %vm241_vm0 = vmmov 0   ;;  %s305_s0 = inlined_call_operand.vmem [shape: bf16[8,32], index: 0, kind: input, shape index: {}]   ;;  %s306_s1 = inlined_call_operand.vmem [shape: bf16[32,32], index: 1, kind: input, shape index: {}]   ;;  %s307_s2 = inlined_call_operand.vmem [shape: f32[1,32], index: 2, kind: input, shape index: {}]   ;;  %s308_s3 = inlined_call_operand.vmem [shape: bf16[32,64], index: 3, kind: input, shape index: {}]   ;;  %s309_s4 = inlined_call_operand.vmem [shape: f32[1,64], index: 4, kind: input, shape index: {}]   ;;  %s310_s5 = inlined_call_operand.hbm [shape: f32[8,32], index: 5, kind: output, shape index: {0}]   ;;  %s311_s6 = inlined_call_operand.vmem [shape: bf16[8,64], index: 6, kind: output, shape index: {1}]  }
   0x1   :  { %v214_v0 = vld [vmem:[%s306_s1 + $0x8] sm:$0xff]   ;;  %195 = vmatprep.subr.bf16.mxu0 %v240_v1  ;;  %203 = vmatprep.subr.bf16.mxu1 %v240_v1  ;;  %v215_v2 = vld [vmem:[%s306_s1] sm:$0xff]  }
   0x2   :  { %196 = vmatpush3.bf16.msra.mxu0 %v214_v0  ;;  %199 = vmatprep.mubr.msk.bf16.mxu0 %vm241_vm0, %v240_v1  ;;  %v216_v3 = vld [vmem:[%s308_s3 + $0x8] sm:$0xff]  }
   0x3   :  { %197 = vmatprep.subr.bf16.mxu0 %v240_v1  ;;  %207 = vmatprep.mubr.msk.bf16.mxu1 %vm241_vm0, %v240_v1 }
   0x4   :  { %204 = vmatpush3.bf16.msra.mxu1 %v216_v3 }
   0x5   :  { %12 = vsyncpa [#allocation3], 0  ;;  %205 = vmatprep.subr.bf16.mxu1 %v240_v1  ;;  %v24_v4 = vld [vmem:[%s305_s0] sm:$0xf]  ;;  %vm48_vm1 = vcmask 261120   ;;  %s242_s0 = smov [#allocation2]  }
   0x6   :  { %198 = vmatpush3.bf16.msra.mxu0 %v215_v2  ;;  %v217_v5 = vld [vmem:[%s308_s3] sm:$0xff]   ;;  %s169_s8 = sshll.u32 %s242_s0, 4  ;;  %s170_s8 = int_to_ptr.vmem [resolvable:$true] %s169_s8 }
   0x7   :  { %v181_v6 = vld [vmem:[%s307_s2] ss:$0 sm:$0xff]  ;;  %s218_s9 = scalar_lea.vmem %s170_s8, 128  ;;  %p223_p1 = scmp.lt.s32.totalorder %s170_s8, %s170_s8 }
   0x8   :  { %206 = vmatpush3.bf16.msra.mxu1 %v217_v5  ;;  %p219_p0 = scmp.ne.s32.totalorder %s170_s8, %s218_s9  ;;  %p224_p2 = scmp.lt.s32.totalorder %s218_s9, %s218_s9 }
   0x9   :  { %200 = vmatmul.mubr.msk.bf16.vlgmr.msra.gmra.mxu0 %vm48_vm1, %v24_v4 }
   0xa   :  { %p225_p3 = por %p224_p2, %p223_p1 }
   0xc   :  { %p226_p4 = pnand %p225_p3, %p219_p0 }
  0xc9   :  { %v86_v7 = vpop.f32.mrf.mxu0 }
  0xca   :  { %v87_v8 = vadd.f32 %v181_v6, %v86_v7 }
  0xcb   :  { %v201_v9 = vpop.f32.mrf.mxu0 }
  0xcc   :  { %v93_v10 = vpack.c.bf16 %v87_v8, %v87_v8  ;;  %92 = vst.msk [vmem:[#allocation2] sm:$0xff] %vm48_vm1, %v87_v8 }
  0xcd   :  { %v89_v11 = vpop.f32.mrf.mxu0 }
  0xce   :  { %208 = vmatmul.mubr.msk.bf16.vlgmr.msra.gmra.mxu1 %vm48_vm1, %v93_v10 }
  0xcf   :  { %v202_v12 = vpop.f32.mrf.mxu0 }
  0xd0   :  { %229 = shalt.err (!%p226_p4)
}
  0xd1   :  { %172 = dma.vmem_to_hbm [thread:$0]  %s170_s8, 128, %s310_s5, [#allocation3]   ;;  %v185_v13 = vld [vmem:[%s309_s4] ss:$0 sm:$0xff]  ;;  %vm161_vm2 = vcmask 519168  }
 0x18e   :  { %v154_v14 = vpop.f32.mrf.mxu1 }
 0x18f   :  { %v155_v15 = vadd.f32 %v185_v13, %v154_v14 }
 0x190   :  { %v209_v16 = vpop.f32.mrf.mxu1 }
 0x191   :  { %v160_v17 = vpack.c.bf16 %v155_v15, %v155_v15 }
 0x192   :  { %v157_v18 = vpop.f32.mrf.mxu1 }
 0x193   :  { %162 = vst.msk [vmem:[%s311_s6] sm:$0xf] %vm161_vm2, %v160_v17 }
 0x194   :  { %v210_v19 = vpop.f32.mrf.mxu1 }
 0x195   :  { %238 = dma.done.wait [#allocation3], 128  }
 0x196   :  { %239 = vsyncadd [#allocation3], 4294967168 }
 0x197   :  { %180 = vsyncpa [#allocation3], 1 }

// kernel: dpbl_layer_forward.5
= control target key start
LH: loop header
LB: loop body
LE: loop exit
PB: predicated region body
PF: predicated region fallthrough
CT: control target
= control target key end

     0   :  { %12 = vsyncpa [#allocation3], 0  ;;  %s380_s0 = inlined_call_operand.vmem [shape: f32[16,32], index: 0, kind: input, shape index: {}]   ;;  %s381_s1 = inlined_call_operand.hbm [shape: f32[1,32], index: 1, kind: input, shape index: {}]   ;;  %s382_s2 = inlined_call_operand.hbm [shape: f32[1,32], index: 2, kind: input, shape index: {}]   ;;  %s383_s3 = inlined_call_operand.vmem [shape: bf16[32,96], index: 3, kind: input, shape index: {}]   ;;  %s384_s4 = inlined_call_operand.hbm [shape: f32[1,96], index: 4, kind: input, shape index: {}]   ;;  %s385_s5 = inlined_call_operand.vmem [shape: bf16[16,64], index: 5, kind: output, shape index: {0}]   ;;  %s386_s6 = inlined_call_operand.vmem [shape: bf16[16,32], index: 6, kind: output, shape index: {1}]  }
   0x1   :  { %13 = vsyncpa [#allocation5], 0  ;;  %s301_s21 = smov [#allocation4]   ;;  %s302_s23 = smov [#allocation2]  }
   0x2   :  { %s32_s22 = sshll.u32 %s301_s21, 4  ;;  %s22_s24 = sshll.u32 %s302_s23, 4  ;;  %s33_s22 = int_to_ptr.vmem [resolvable:$true] %s32_s22  ;;  %s23_s24 = int_to_ptr.vmem [resolvable:$true] %s22_s24 }
   0x3   :  { %s245_s25 = scalar_lea.vmem %s33_s22, 16  ;;  %s249_s26 = scalar_lea.vmem %s33_s22, 32 }
   0x4   :  { %p246_p0 = scmp.ne.s32.totalorder %s33_s22, %s245_s25  ;;  %p250_p1 = scmp.lt.s32.totalorder %s33_s22, %s33_s22 }
   0x5   :  { %p251_p2 = scmp.lt.s32.totalorder %s249_s26, %s245_s25 }
   0x7   :  { %p252_p3 = por %p251_p2, %p250_p1 }
   0x9   :  { %p253_p4 = pnand %p252_p3, %p246_p0 }
   0xb   :  { %256 = shalt.err (!%p253_p4)
}
   0xc   :  { %35 = dma.hbm_to_vmem [thread:$0]  %s382_s2, 16, %s33_s22, [#allocation5]  }
   0xd   :  { %s265_s29 = scalar_lea.vmem %s23_s24, 16  ;;  %s269_s30 = scalar_lea.vmem %s23_s24, 32 }
   0xe   :  { %p266_p5 = scmp.ne.s32.totalorder %s23_s24, %s265_s29  ;;  %p270_p6 = scmp.lt.s32.totalorder %s23_s24, %s23_s24 }
   0xf   :  { %p271_p7 = scmp.lt.s32.totalorder %s269_s30, %s265_s29 }
  0x11   :  { %p272_p8 = por %p271_p7, %p270_p6 }
  0x13   :  { %p273_p9 = pnand %p272_p8, %p266_p5 }
  0x15   :  { %276 = shalt.err (!%p273_p9)
}
  0x16   :  { %25 = dma.hbm_to_vmem [thread:$0]  %s381_s1, 16, %s23_s24, [#allocation3]  }
  0x17   :  { %s303_s9 = smov [#allocation6]  }
  0x18   :  { %s44_s10 = sshll.u32 %s303_s9, 4  ;;  %s45_s10 = int_to_ptr.vmem [resolvable:$true] %s44_s10 }
  0x19   :  { %s285_s11 = scalar_lea.vmem %s45_s10, 16  ;;  %s289_s12 = scalar_lea.vmem %s45_s10, 32 }
  0x1a   :  { %p286_p10 = scmp.ne.s32.totalorder %s45_s10, %s285_s11  ;;  %p290_p11 = scmp.lt.s32.totalorder %s45_s10, %s45_s10 }
  0x1b   :  { %p291_p12 = scmp.lt.s32.totalorder %s289_s12, %s285_s11 }
  0x1d   :  { %p292_p13 = por %p291_p12, %p290_p11 }
  0x1f   :  { %p293_p0 = pnand %p292_p13, %p286_p10 }
  0x21   :  { %296 = shalt.err (!%p293_p0)
}
  0x22   :  { %47 = dma.hbm_to_vmem [thread:$0]  %s384_s4, 16, %s45_s10, [#allocation5]  }
  0x23   :  { %297 = dma.done.wait [#allocation3], 16  }
  0x24   :  { %298 = vsyncadd [#allocation3], 4294967280 }
  0x25   :  { %299 = dma.done.wait [#allocation5], 32  }
  0x26   :  { %300 = vsyncadd [#allocation5], 4294967264  ;;  %vm62_vm0 = vcmask 261120   ;;  %v58_v0 = vld [vmem:[%s380_s0] sm:$0xff]  ;;  %v59_v1 = vld [vmem:[%s380_s0 + $0x8] sm:$0xff]  ;;  %v304_v15 = vmov 0.0  }
  0x27   :  { %v63_v2 = vsel %vm62_vm0, %v58_v0, 0.0  ;;  %v66_v3 = vsel %vm62_vm0, %v59_v1, 0.0  ;;  %v231_v14 = vld [vmem:[%s383_s3 + $0x8] sm:$0xff]   ;;  %217 = vmatprep.subr.bf16.mxu0 %v304_v15  ;;  %vm305_vm1 = vmmov 0   ;;  %v232_v16 = vld [vmem:[%s383_s3] sm:$0xff]   ;;  %vm182_vm2 = vcmask 519168  }
  0x28   :  { %64 = vadd.xlane.f32.xlu0 %v63_v2  ;;  %221 = vmatprep.mubr.msk.bf16.mxu0 %vm305_vm1, %v304_v15  ;;  %v204_v25 = vld [vmem:[#allocation2] ss:$0 sm:$0xff]  ;;  %v205_v29 = vld [vmem:[#allocation4] ss:$0 sm:$0xff]  ;;  %v206_v34 = vld [vmem:[#allocation6] ss:$0 sm:$0xff] }
  0x29   :  { %218 = vmatpush3.bf16.msra.mxu0 %v231_v14  ;;  %s306_s20 = smov 64   ;;  %vm191_vm3 = vcmask 257024  }
  0x2a   :  { %219 = vmatprep.subr.bf16.mxu0 %v304_v15 }
  0x2c   :  { %67 = vadd.xlane.f32.xlu0 %v66_v3 }
  0x2d   :  { %220 = vmatpush3.bf16.msra.mxu0 %v232_v16 }
  0xb1   :  { %v65_v4 = vpop.xlane.xlu0 %64 }
  0xb2   :  { %v70_v5 = vmul.f32 0.03125, %v65_v4 }
  0xb4   :  { %v72_v6 = vsub.f32 %v58_v0, %v70_v5 }
  0xb5   :  { %v68_v7 = vpop.xlane.xlu0 %67 }
  0xb6   :  { %v71_v8 = vmul.f32 0.03125, %v68_v7  ;;  %v74_v9 = vmul.f32 %v72_v6, %v72_v6 }
  0xb8   :  { %v73_v10 = vsub.f32 %v59_v1, %v71_v8  ;;  %v76_v11 = vsel %vm62_vm0, %v74_v9, 0.0 }
  0xb9   :  { %77 = vadd.xlane.f32.xlu1 %v76_v11 }
  0xba   :  { %v75_v12 = vmul.f32 %v73_v10, %v73_v10 }
  0xbc   :  { %v79_v13 = vsel %vm62_vm0, %v75_v12, 0.0 }
  0xbd   :  { %80 = vadd.xlane.f32.xlu1 %v79_v13 }
 0x142   :  { %v78_v17 = vpop.xlane.xlu1 %77 }
 0x143   :  { %v82_v18 = vmul.f32 0.03125, %v78_v17 }
 0x145   :  { %v84_v19 = vadd.f32 1e-06, %v82_v18 }
 0x146   :  { %v81_v20 = vpop.xlane.xlu1 %80 }
 0x147   :  { %233 = vrsqrt.f32 %v84_v19  ;;  %v83_v21 = vmul.f32 0.03125, %v81_v20 }
 0x149   :  { %v85_v22 = vadd.f32 1e-06, %v83_v21 }
 0x14b   :  { %235 = vrsqrt.f32 %v85_v22 }
 0x154   :  { %v234_v23 = vpop.eup %233 }
 0x155   :  { %v88_v24 = vmul.f32 %v234_v23, %v72_v6 }
 0x157   :  { %v96_v28 = vmul.f32 %v204_v25, %v88_v24 }
 0x158   :  { %v236_v26 = vpop.eup %235 }
 0x159   :  { %v89_v27 = vmul.f32 %v236_v26, %v73_v10  ;;  %v104_v31 = vadd.f32 %v205_v29, %v96_v28 }
 0x15b   :  { %v97_v30 = vmul.f32 %v204_v25, %v89_v27 }
 0x15d   :  { %v105_v32 = vadd.f32 %v205_v29, %v97_v30 }
 0x15f   :  { %v106_v33 = vpack.c.bf16 %v105_v32, %v104_v31 }
 0x161   :  { %222 = vmatmul.mubr.msk.bf16.vlgmr.msra.gmra.mxu0 %vm62_vm0, %v106_v33 }
 0x221   :  { %v167_v35 = vpop.f32.mrf.mxu0 }
 0x222   :  { %v168_v36 = vadd.f32 %v206_v34, %v167_v35 }
 0x223   :  { %v223_v37 = vpop.f32.mrf.mxu0 }
 0x224   :  { %v212_v38 = vpack.c.bf16 %v168_v36, %v168_v36 }
 0x225   :  { %v170_v39 = vpop.f32.mrf.mxu0 }
 0x226   :  { %183 = vst.msk [vmem:[%s385_s5] sm:$0xf] %vm182_vm2, %v212_v38  ;;  %v171_v40 = vadd.f32 %v206_v34, %v170_v39  ;;  %185 = vrot.lane.b32.xlu0 %v212_v38, %s306_s20 }
 0x227   :  { %v224_v41 = vpop.f32.mrf.mxu0 }
 0x228   :  { %v213_v42 = vpack.c.bf16 %v171_v40, %v171_v40 }
 0x22a   :  { %184 = vst.msk [vmem:[%s385_s5 + $0x4] sm:$0xf] %vm182_vm2, %v213_v42  ;;  %187 = vrot.lane.b32.xlu1 %v213_v42, %s306_s20 }
 0x298   :  { %v186_v43 = vpop.permute.xlu0 %185 }
 0x299   :  { %192 = vst.msk [vmem:[%s386_s6] sm:$0xf] %vm191_vm3, %v186_v43 }
 0x29c   :  { %v188_v44 = vpop.permute.xlu1 %187 }
 0x29d   :  { %193 = vst.msk [vmem:[%s386_s6 + $0x4] sm:$0xf] %vm191_vm3, %v188_v44 }
 0x29e   :  { %202 = vsyncpa [#allocation3], 1 }
 0x29f   :  { %203 = vsyncpa [#allocation5], 1 }

// kernel: dpbl_layer_forward.9
= control target key start
LH: loop header
LB: loop body
LE: loop exit
PB: predicated region body
PF: predicated region fallthrough
CT: control target
= control target key end

     0   :  { %v542_v1 = vmov 0.0   ;;  %vm543_vm0 = vmmov 0   ;;  %vm66_vm1 = vcmask 261120   ;;  %s692_s0 = inlined_call_operand.vmem [shape: bf16[16,32], index: 0, kind: input, shape index: {}]   ;;  %s693_s1 = inlined_call_operand.vmem [shape: f32[16,32], index: 1, kind: input, shape index: {}]   ;;  %s694_s2 = inlined_call_operand.vmem [shape: bf16[32,32], index: 2, kind: input, shape index: {}]   ;;  %s695_s3 = inlined_call_operand.vmem [shape: f32[1,32], index: 3, kind: input, shape index: {}]   ;;  %s696_s4 = inlined_call_operand.vmem [shape: f32[1,32], index: 4, kind: input, shape index: {}]   ;;  %s697_s5 = inlined_call_operand.vmem [shape: f32[1,32], index: 5, kind: input, shape index: {}]   ;;  %s698_s6 = inlined_call_operand.vmem [shape: bf16[32,128], index: 6, kind: input, shape index: {}]   ;;  %s699_s7 = inlined_call_operand.vmem [shape: f32[1,128], index: 7, kind: input, shape index: {}]   ;;  %s700_s8 = inlined_call_operand.vmem [shape: bf16[128,32], index: 8, kind: input, shape index: {}]   ;;  %s701_s9 = inlined_call_operand.vmem [shape: f32[1,32], index: 9, kind: input, shape index: {}]   ;;  %s702_s10 = inlined_call_operand.hbm [shape: f32[16,32], index: 10, kind: output, shape index: {}]  }
   0x1   :  { %v498_v0 = vld [vmem:[%s694_s2 + $0x8] sm:$0xff]   ;;  %457 = vmatprep.subr.bf16.mxu1 %v542_v1  ;;  %473 = vmatprep.subr.bf16.mxu0 %v542_v1  ;;  %v499_v2 = vld [vmem:[%s694_s2] sm:$0xff]  }
   0x2   :  { %458 = vmatpush3.bf16.msra.mxu1 %v498_v0  ;;  %461 = vmatprep.mubr.msk.bf16.mxu1 %vm543_vm0, %v542_v1  ;;  %v500_v3 = vld [vmem:[%s692_s0] sm:$0xff]  }
   0x3   :  { %459 = vmatprep.subr.bf16.mxu1 %v542_v1  ;;  %489 = vmatprep.mubr.msk.bf16.mxu0 %vm543_vm0, %v542_v1 }
   0x6   :  { %460 = vmatpush3.bf16.msra.mxu1 %v499_v2 }
   0x7   :  { %465 = vmatprep.subr.bf16.mxu1 %v542_v1 }
   0x9   :  { %462 = vmatmul.mubr.msk.bf16.vlgmr.msra.gmra.mxu1 %vm66_vm1, %v500_v3 }
   0xa   :  { %469 = vmatprep.mubr.msk.bf16.mxu1 %vm543_vm0, %v542_v1 }
   0xb   :  { %15 = vsyncpa [#allocation5], 0  ;;  %v41_v4 = vld [vmem:[%s693_s1] sm:$0xff]  ;;  %v42_v10 = vld [vmem:[%s693_s1 + $0x8] sm:$0xff]  ;;  %vm175_vm2 = vcmask 257024  }
   0xc   :  { %v421_v6 = vld [vmem:[%s695_s3] ss:$0 sm:$0xff]  ;;  %v501_v30 = vld [vmem:[%s698_s6 + $0x8] sm:$0xff]   ;;  %v504_v51 = vld [vmem:[%s700_s8 + $0x38] sm:$0xff]  }
   0xd   :  { %v426_v8 = vld [vmem:[%s701_s9] ss:$0 sm:$0xff]  ;;  %466 = vmatpush3.bf16.msra.mxu1 %v501_v30  ;;  %474 = vmatpush3.bf16.msra.mxu0 %v504_v51  ;;  %v505_v52 = vld [vmem:[%s700_s8 + $0x30] sm:$0xff]   ;;  %v506_v53 = vld [vmem:[%s700_s8 + $0x28] sm:$0xff]  }
   0xe   :  { %v502_v31 = vld [vmem:[%s698_s6] sm:$0xff]   ;;  %467 = vmatprep.subr.bf16.mxu1 %v542_v1  ;;  %475 = vmatprep.subr.bf16.mxu0 %v542_v1  ;;  %v508_v55 = vld [vmem:[%s700_s8 + $0x18] sm:$0xff]   ;;  %v509_v56 = vld [vmem:[%s700_s8 + $0x10] sm:$0xff]  }
   0xf   :  { %v422_v39 = vld [vmem:[%s696_s4] ss:$0 sm:$0xff]  ;;  %v510_v57 = vld [vmem:[%s700_s8 + $0x8] sm:$0xff]  }
  0x10   :  { %v423_v41 = vld [vmem:[%s697_s5] ss:$0 sm:$0xff] }
  0x11   :  { %468 = vmatpush3.bf16.msra.mxu1 %v502_v31  ;;  %476 = vmatpush3.bf16.msra.mxu0 %v505_v52  ;;  %v507_v54 = vld [vmem:[%s700_s8 + $0x20] sm:$0xff]  }
  0x12   :  { %477 = vmatprep.subr.bf16.mxu0 %v542_v1  ;;  %v511_v58 = vld [vmem:[%s700_s8] sm:$0xff]  }
  0x13   :  { %v427_v59 = vld [vmem:[%s699_s7] ss:$0 sm:$0xff]  ;;  %s544_s7 = smov [#allocation4]  }
  0x14   :  { %s406_s8 = sshll.u32 %s544_s7, 4  ;;  %s407_s8 = int_to_ptr.vmem [resolvable:$true] %s406_s8 }
  0x15   :  { %478 = vmatpush3.bf16.msra.mxu0 %v506_v53  ;;  %s520_s23 = scalar_lea.vmem %s407_s8, 256  ;;  %p525_p1 = scmp.lt.s32.totalorder %s407_s8, %s407_s8 }
  0x16   :  { %479 = vmatprep.subr.bf16.mxu0 %v542_v1  ;;  %p521_p0 = scmp.ne.s32.totalorder %s407_s8, %s520_s23  ;;  %p526_p2 = scmp.lt.s32.totalorder %s520_s23, %s520_s23 }
  0x18   :  { %p527_p3 = por %p526_p2, %p525_p1 }
  0x19   :  { %480 = vmatpush3.bf16.msra.mxu0 %v507_v54 }
  0x1a   :  { %481 = vmatprep.subr.bf16.mxu0 %v542_v1  ;;  %p528_p4 = pnand %p527_p3, %p521_p0 }
  0x1d   :  { %482 = vmatpush3.bf16.msra.mxu0 %v508_v55 }
  0x1e   :  { %483 = vmatprep.subr.bf16.mxu0 %v542_v1 }
  0x21   :  { %484 = vmatpush3.bf16.msra.mxu0 %v509_v56 }
  0x22   :  { %485 = vmatprep.subr.bf16.mxu0 %v542_v1 }
  0x25   :  { %486 = vmatpush3.bf16.msra.mxu0 %v510_v57 }
  0x26   :  { %487 = vmatprep.subr.bf16.mxu0 %v542_v1 }
  0x29   :  { %488 = vmatpush3.bf16.msra.mxu0 %v511_v58 }
  0xc9   :  { %v104_v5 = vpop.f32.mrf.mxu1 }
  0xca   :  { %v111_v7 = vadd.f32 %v104_v5, %v41_v4 }
  0xcb   :  { %v463_v9 = vpop.f32.mrf.mxu1 }
  0xcc   :  { %v120_v11 = vadd.f32 %v421_v6, %v111_v7 }
  0xcd   :  { %v107_v12 = vpop.f32.mrf.mxu1 }
  0xce   :  { %v185_v13 = vadd.f32 %v426_v8, %v120_v11  ;;  %v112_v14 = vadd.f32 %v107_v12, %v42_v10  ;;  %v124_v15 = vsel %vm66_vm1, %v120_v11, 0.0 }
  0xcf   :  { %v464_v16 = vpop.f32.mrf.mxu1  ;;  %125 = vadd.xlane.f32.xlu0 %v124_v15 }
  0xd0   :  { %187 = vst.msk [vmem:[#allocation3] sm:$0xff] %vm66_vm1, %v185_v13  ;;  %v121_v17 = vadd.f32 %v421_v6, %v112_v14 }
  0xd2   :  { %v186_v18 = vadd.f32 %v426_v8, %v121_v17  ;;  %v127_v19 = vsel %vm66_vm1, %v121_v17, 0.0 }
  0xd3   :  { %128 = vadd.xlane.f32.xlu0 %v127_v19 }
  0xd4   :  { %188 = vst.msk [vmem:[#allocation3 + $0x8] sm:$0xff] %vm66_vm1, %v186_v18 }
 0x158   :  { %v126_v20 = vpop.xlane.xlu0 %125 }
 0x159   :  { %v131_v21 = vmul.f32 0.03125, %v126_v20 }
 0x15b   :  { %v133_v22 = vsub.f32 %v120_v11, %v131_v21  ;;  %v282_v21 = vld [vmem:[#allocation3] sm:$0xff] }
 0x15c   :  { %v129_v23 = vpop.xlane.xlu0 %128 }
 0x15d   :  { %v132_v24 = vmul.f32 0.03125, %v129_v23  ;;  %v135_v25 = vmul.f32 %v133_v22, %v133_v22 }
 0x15f   :  { %v134_v26 = vsub.f32 %v121_v17, %v132_v24  ;;  %v137_v27 = vsel %vm66_vm1, %v135_v25, 0.0  ;;  %v283_v25 = vld [vmem:[#allocation3 + $0x8] sm:$0xff] }
 0x160   :  { %138 = vadd.xlane.f32.xlu1 %v137_v27 }
 0x161   :  { %v136_v28 = vmul.f32 %v134_v26, %v134_v26 }
 0x163   :  { %v140_v29 = vsel %vm66_vm1, %v136_v28, 0.0 }
 0x164   :  { %141 = vadd.xlane.f32.xlu1 %v140_v29 }
 0x1e9   :  { %v139_v32 = vpop.xlane.xlu1 %138 }
 0x1ea   :  { %v143_v33 = vmul.f32 0.03125, %v139_v32 }
 0x1ec   :  { %v145_v34 = vadd.f32 1e-06, %v143_v33 }
 0x1ed   :  { %v142_v35 = vpop.xlane.xlu1 %141 }
 0x1ee   :  { %512 = vrsqrt.f32 %v145_v34  ;;  %v144_v36 = vmul.f32 0.03125, %v142_v35 }
 0x1f0   :  { %v146_v37 = vadd.f32 1e-06, %v144_v36 }
 0x1f2   :  { %514 = vrsqrt.f32 %v146_v37 }
 0x1fb   :  { %v513_v38 = vpop.eup %512 }
 0x1fc   :  { %v149_v40 = vmul.f32 %v513_v38, %v133_v22 }
 0x1fe   :  { %v157_v42 = vmul.f32 %v422_v39, %v149_v40 }
 0x1ff   :  { %v515_v43 = vpop.eup %514 }
 0x200   :  { %v165_v44 = vadd.f32 %v423_v41, %v157_v42  ;;  %v150_v45 = vmul.f32 %v515_v43, %v134_v26 }
 0x202   :  { %v440_v46 = vpack.c.bf16 %v165_v44, %v165_v44  ;;  %v158_v47 = vmul.f32 %v422_v39, %v150_v45 }
 0x204   :  { %176 = vst.msk [vmem:[#allocation2] sm:$0xf] %vm175_vm2, %v440_v46  ;;  %v166_v48 = vadd.f32 %v423_v41, %v158_v47 }
 0x206   :  { %v441_v49 = vpack.c.bf16 %v166_v48, %v166_v48 }
 0x208   :  { %177 = vst.msk [vmem:[#allocation2 + $0x4] sm:$0xf] %vm175_vm2, %v441_v49 }
 0x20f   :  { %v503_v50 = vld [vmem:[#allocation2] sm:$0xff]  }
 0x210   :  { %470 = vmatmul.mubr.msk.bf16.vlgmr.msra.gmra.mxu1 %vm66_vm1, %v503_v50 }
 0x2d0   :  { %v257_v60 = vpop.f32.mrf.mxu1 }
 0x2d1   :  { %v258_v61 = vadd.f32 %v427_v59, %v257_v60 }
 0x2d2   :  { %v471_v62 = vpop.f32.mrf.mxu1 }
 0x2d3   :  { %v266_v63 = vmul.f32 %v258_v61, %v258_v61  ;;  %v264_v15 = vmul.f32 0.5, %v258_v61 }
 0x2d4   :  { %v260_v0 = vpop.f32.mrf.mxu1 }
 0x2d5   :  { %v268_v2 = vmul.f32 %v266_v63, %v258_v61  ;;  %v261_v3 = vadd.f32 %v427_v59, %v260_v0 }
 0x2d6   :  { %v472_v4 = vpop.f32.mrf.mxu1 }
 0x2d7   :  { %v270_v5 = vmul.f32 0.044715, %v268_v2  ;;  %v267_v6 = vmul.f32 %v261_v3, %v261_v3  ;;  %v265_v16 = vmul.f32 0.5, %v261_v3 }
 0x2d9   :  { %v272_v7 = vadd.f32 %v270_v5, %v258_v61  ;;  %v269_v8 = vmul.f32 %v267_v6, %v261_v3 }
 0x2db   :  { %v274_v9 = vmul.f32 0.7978846, %v272_v7  ;;  %v271_v10 = vmul.f32 0.044715, %v269_v8 }
 0x2dd   :  { %516 = vtanh.f32 %v274_v9  ;;  %v273_v1 = vadd.f32 %v271_v10, %v261_v3 }
 0x2df   :  { %v275_v11 = vmul.f32 0.7978846, %v273_v1 }
 0x2e1   :  { %518 = vtanh.f32 %v275_v11 }
 0x2ea   :  { %v517_v12 = vpop.eup %516 }
 0x2eb   :  { %v278_v13 = vadd.f32 1.0, %v517_v12 }
 0x2ed   :  { %v280_v18 = vmul.f32 %v278_v13, %v264_v15 }
 0x2ee   :  { %v519_v14 = vpop.eup %518 }
 0x2ef   :  { %v279_v17 = vadd.f32 1.0, %v519_v14 }
 0x2f1   :  { %v281_v19 = vmul.f32 %v279_v17, %v265_v16 }
 0x2f3   :  { %v284_v20 = vpack.c.bf16 %v281_v19, %v280_v18 }
 0x2f5   :  { %490 = vmatmul.mubr.bf16.vlgmr.msra.gmra.mxu0 %v284_v20 }
 0x3b5   :  { %v383_v22 = vpop.f32.mrf.mxu0 }
 0x3b6   :  { %v390_v23 = vadd.f32 %v383_v22, %v282_v21 }
 0x3b7   :  { %v491_v24 = vpop.f32.mrf.mxu0 }
 0x3b8   :  { %392 = vst.msk [vmem:[#allocation3] sm:$0xff] %vm66_vm1, %v390_v23 }
 0x3b9   :  { %v386_v26 = vpop.f32.mrf.mxu0 }
 0x3ba   :  { %v391_v27 = vadd.f32 %v386_v26, %v283_v25 }
 0x3bb   :  { %v492_v28 = vpop.f32.mrf.mxu0 }
 0x3bc   :  { %393 = vst.msk [vmem:[#allocation3 + $0x8] sm:$0xff] %vm66_vm1, %v391_v27 }
 0x3bf   :  { %v397_v29 = vld [vmem:[#allocation3] sm:$0xff] }
 0x3c0   :  { %399 = vst.msk [vmem:[#allocation4] sm:$0xff] %vm66_vm1, %v397_v29 }
 0x3c3   :  { %v398_v30 = vld [vmem:[#allocation3 + $0x8] sm:$0xff] }
 0x3c4   :  { %400 = vst.msk [vmem:[#allocation4 + $0x8] sm:$0xff] %vm66_vm1, %v398_v30 }
 0x3c5   :  { %531 = shalt.err (!%p528_p4)
}
 0x3c6   :  { %s545_s24 = smov 128   ;;  %s546_s1 = smov 8  }
 0x3c7   :  { %412 = dma.vmem_to_hbm [thread:$0]  %s407_s8, 256, %s702_s10, [#allocation5], %s545_s24, %s545_s24, %s546_s1  }
 0x3c8   :  { %540 = dma.done.wait [#allocation5], 256  }
 0x3c9   :  { %541 = vsyncadd [#allocation5], 4294967040 }
 0x3ca   :  { %416 = vsyncpa [#allocation5], 1 }

</bundles_post_ra>
